<compile_context>
chip_gen: v6e
topology: v6e:2x2x1
jax: 0.10.0
libtpu: 0.0.40
codegen_flags: <defaults>
</compile_context>

<pallas_src>
import functools

import jax
import jax.numpy as jnp
from jax.experimental import pallas as pl
from jax.experimental.pallas import tpu as pltpu


def perceiver_attn_kernel(x_ref, lat_ref,
                          w_lat_ref, b_lat_ref,
                          w_x_ref, b_x_ref,
                          wo_ref, bo_ref,
                          pnw_ref,
                          w1_ref, b1_ref,
                          w2_ref, b2_ref,
                          out_ref, *, n_heads, approx_recip):
    TB, P, D = x_ref.shape
    K = lat_ref.shape[1]
    H = n_heads
    Dh = D // H
    cd = x_ref.dtype                       # compute dtype (f32 or bf16)
    inv_dh = 1.0 / float(Dh)

    x2 = x_ref[...].reshape(TB * P, D)             # (TB*P, D)  compute dtype
    lat_f32 = lat_ref[...].reshape(TB * K, D)      # (TB*K, D)  f32 (residuals)
    lat2 = lat_f32.astype(cd)

    # Fused, lane-dense projections (the FLOP-dominant matmuls).
    lat_proj = jnp.dot(lat2, w_lat_ref[...],
                       preferred_element_type=jnp.float32) + b_lat_ref[...]  # (TB*K, 3D)
    x_proj = jnp.dot(x2, w_x_ref[...],
                     preferred_element_type=jnp.float32) + b_x_ref[...]      # (TB*P, 2D)

    q = (lat_proj[:, :D] * inv_dh).reshape(TB, K, D).astype(cd)  # scale folded into q
    kl = lat_proj[:, D:2 * D].reshape(TB, K, D).astype(cd)
    vl = lat_proj[:, 2 * D:].reshape(TB, K, D).astype(cd)
    kx = x_proj[:, :D].reshape(TB, P, D).astype(cd)
    vx = x_proj[:, D:].reshape(TB, P, D).astype(cd)

    # Per-head attention.  Joint softmax over the x piece and the latent piece
    # == softmax over torch.cat([x, latents], dim=1).  The per-head tensors are
    # tiny (K rows), so a short unrolled loop over lane slices is fine; the
    # heavy matmuls above are already head-fused.
    head_outs = []
    for h in range(H):
        hsl = slice(h * Dh, (h + 1) * Dh)
        qh = q[:, :, hsl]
        sx = jnp.einsum('bkd,bpd->bkp', qh, kx[:, :, hsl],
                        preferred_element_type=jnp.float32)
        sl = jnp.einsum('bkd,bld->bkl', qh, kl[:, :, hsl],
                        preferred_element_type=jnp.float32)
        m = jnp.maximum(jnp.max(sx, axis=-1, keepdims=True),
                        jnp.max(sl, axis=-1, keepdims=True))
        ex = jnp.exp(sx - m)
        el = jnp.exp(sl - m)
        denom = (jnp.sum(ex, axis=-1, keepdims=True)
                 + jnp.sum(el, axis=-1, keepdims=True))
        ov = (jnp.einsum('bkp,bpd->bkd', ex.astype(cd), vx[:, :, hsl],
                         preferred_element_type=jnp.float32)
              + jnp.einsum('bkl,bld->bkd', el.astype(cd), vl[:, :, hsl],
                           preferred_element_type=jnp.float32))
        head_outs.append(ov * pl.reciprocal(denom, approx=approx_recip))

    attn = jnp.concatenate(head_outs, axis=-1).reshape(TB * K, D)   # 'b k (h d)'

    # Output projection + residual (original f32 latents), RMSNorm, MLP, residual.
    attn_out = (jnp.dot(attn.astype(cd), wo_ref[...],
                        preferred_element_type=jnp.float32)
                + bo_ref[...] + lat_f32)
    ms = jnp.mean(attn_out * attn_out, axis=-1, keepdims=True)
    normed = attn_out * jax.lax.rsqrt(ms + 1e-6) * pnw_ref[...]
    # TODO(synk): MLP body not given in the source snippet; standard
    # Linear(D, 4D) -> GELU (tanh approx) -> Linear(4D, D) assumed.
    hmid = jnp.dot(normed.astype(cd), w1_ref[...],
                   preferred_element_type=jnp.float32) + b1_ref[...]
    hmid = jax.nn.gelu(hmid, approximate=True)
    mlp_out = jnp.dot(hmid.astype(cd), w2_ref[...],
                      preferred_element_type=jnp.float32) + b2_ref[...]
    out = mlp_out + lat_f32                 # second residual: ORIGINAL latents
    out_ref[...] = out.reshape(TB, K, D).astype(out_ref.dtype)

    # TODO(synk): attention_mask path not implemented (the source branch is
    # buggy: it reuses the tensor `k` as a repeat size); mask=None path only.
    # TODO(synk): for very large in_seq (P), stream the x block over P with an
    # online softmax instead of materializing the (TB*P, 2D) projection at once.


def perceiver_attn(x, latents, params, n_heads, *, tile_b=None,
                   compute_dtype=jnp.float32, out_dtype=None):
    (wq, bq, wk, bk, wv, bv, wo, bo, pnw, w1, b1, w2, b2) = params
    B, P, D = x.shape
    K = latents.shape[1]
    H = n_heads
    assert D % H == 0
    if tile_b is None:
        # nb >= 2 keeps both v7x TensorCores busy on the "parallel" batch axis.
        tile_b = B // 2 if (B % 2 == 0 and B >= 2) else B
    assert B % tile_b == 0, "batch must be divisible by tile_b"
    nb = B // tile_b
    cd = jnp.dtype(compute_dtype)
    if out_dtype is None:
        out_dtype = latents.dtype
    Dm = w1.shape[1]                         # MLP hidden width

    # Fuse the projection weights OUTSIDE the kernel (cheap XLA concatenates):
    #   latent side [Wq | Wk | Wv] : (D, 3D)       x side [Wk | Wv] : (D, 2D)
    w_lat = jnp.concatenate([wq, wk, wv], axis=1).astype(cd)
    b_lat = jnp.concatenate([bq, bk, bv], axis=1).astype(jnp.float32)
    w_x = jnp.concatenate([wk, wv], axis=1).astype(cd)
    b_x = jnp.concatenate([bk, bv], axis=1).astype(jnp.float32)

    def const_spec(shape):                   # constant-index, single-buffered
        nd = len(shape)
        return pl.BlockSpec(shape, lambda b: (0,) * nd,
                            pipeline_mode=pl.Buffered(1))

    in_specs = [
        pl.BlockSpec((tile_b, P, D), lambda b: (b, 0, 0)),   # x (compute dtype)
        pl.BlockSpec((tile_b, K, D), lambda b: (b, 0, 0)),   # latents (f32)
        const_spec((D, 3 * D)), const_spec((1, 3 * D)),      # fused latent proj
        const_spec((D, 2 * D)), const_spec((1, 2 * D)),      # fused x proj
        const_spec((D, D)), const_spec((1, D)),              # out proj
        const_spec((1, D)),                                  # postnorm RMS weight
        const_spec((D, Dm)), const_spec((1, Dm)),            # mlp fc1
        const_spec((Dm, D)), const_spec((1, D)),             # mlp fc2
    ]

    # VMEM budget: pipelined blocks (x2) + single-buffered weights + temps.
    isz = lambda dt: jnp.dtype(dt).itemsize
    weight_bytes = ((3 * D * D + 2 * D * D + D * D + D * Dm + Dm * D) * isz(cd)
                    + (3 * D + 2 * D + D + D + Dm + D) * 4)
    block_bytes = 2 * (tile_b * P * D * isz(cd)
                       + tile_b * K * D * 4
                       + tile_b * K * D * isz(out_dtype))
    temp_bytes = 4 * (tile_b * P * 2 * D          # x-side projection (f32)
                      + tile_b * K * 3 * D        # latent-side projection (f32)
                      + tile_b * K * Dm           # hmid (f32)
                      + 6 * tile_b * K * D)       # attn / residual / norm temps
    vmem_est = weight_bytes + block_bytes + temp_bytes
    # Cap at 48 MiB so the request fits v7x's 64 MiB physical VMEM.
    # TODO(synk): on v5e/v6e (128 MiB VMEM) this cap can be raised to ~100 MiB
    # to allow a larger tile_b when in_seq is big.
    vmem_limit = int(min(max(2 * vmem_est, 32 * 1024 * 1024), 48 * 1024 * 1024))

    kernel = functools.partial(perceiver_attn_kernel, n_heads=H,
                               approx_recip=(cd != jnp.dtype(jnp.float32)))

    return pl.pallas_call(
        kernel,
        out_shape=jax.ShapeDtypeStruct((B, K, D), out_dtype),
        grid=(nb,),
        in_specs=in_specs,
        out_specs=pl.BlockSpec((tile_b, K, D), lambda b: (b, 0, 0)),
        compiler_params=pltpu.CompilerParams(
            dimension_semantics=("parallel",),
            vmem_limit_bytes=vmem_limit),
    )(x.astype(cd), latents.astype(jnp.float32),
      w_lat, b_lat, w_x, b_x,
      wo.astype(cd), bo.astype(jnp.float32), pnw.astype(jnp.float32),
      w1.astype(cd), b1.astype(jnp.float32),
      w2.astype(cd), b2.astype(jnp.float32))


def reference(x, latents, wq, bq, wkv, bkv, wo, bo, pnw, w1, b1, w2, b2, n_heads):
    """Plain-JAX transcription of the PyTorch forward (mask=None path)."""
    B, P, D = x.shape
    K = latents.shape[1]
    Dh = D // n_heads
    h = jnp.concatenate([x, latents], axis=1)
    q = (latents @ wq + bq).reshape(B, K, n_heads, Dh)
    kv = (h @ wkv + bkv).reshape(B, P + K, n_heads, Dh, 2)   # '(h d kv)' layout
    kk, vv = kv[..., 0], kv[..., 1]
    aw = jnp.einsum('bkhd,bnhd->bhkn', q, kk) / Dh
    aw = jax.nn.softmax(aw.astype(jnp.float32), axis=-1)
    ao = jnp.einsum('bhkn,bnhd->bkhd', aw, vv).reshape(B, K, D)
    ao = ao @ wo + bo + latents
    normed = ao * jax.lax.rsqrt(jnp.mean(ao * ao, axis=-1, keepdims=True) + 1e-6) * pnw
    m = jax.nn.gelu(normed @ w1 + b1, approximate=True) @ w2 + b2
    return m + latents


if __name__ == "__main__":
    # Small but lane-dense demo shapes (D multiple of 128 keeps every matmul /
    # store unmasked; K small as in the module's intended pooling use).
    B, P, K, D, H = 4, 16, 8, 128, 4
    Dh = D // H
    scale = 0.1

    key = jax.random.PRNGKey(0)
    ks = jax.random.split(key, 12)

    x = jax.random.normal(ks[0], (B, P, D), jnp.float32)
    latents = jax.random.normal(ks[1], (B, K, D), jnp.float32)

    # parameters ((in, out) layout; deterministic synthetic init)
    wq = jax.random.normal(ks[2], (D, D), jnp.float32) * scale
    bq = jax.random.normal(ks[3], (1, D), jnp.float32) * scale
    wkv = jax.random.normal(ks[4], (D, 2 * D), jnp.float32) * scale   # '(h d kv)'
    bkv = jax.random.normal(ks[5], (1, 2 * D), jnp.float32) * scale
    wo = jax.random.normal(ks[6], (D, D), jnp.float32) * scale
    bo = jax.random.normal(ks[7], (1, D), jnp.float32) * scale
    pnw = jnp.ones((1, D), jnp.float32)                               # RMSNorm scale
    w1 = jax.random.normal(ks[8], (D, 4 * D), jnp.float32) * scale
    b1 = jax.random.normal(ks[9], (1, 4 * D), jnp.float32) * scale
    w2 = jax.random.normal(ks[10], (4 * D, D), jnp.float32) * scale
    b2 = jax.random.normal(ks[11], (1, D), jnp.float32) * scale

    # Split the interleaved kv projection ('b n (h d kv) -> kv b n h d') into
    # contiguous K and V projections before handing it to the kernel wrapper.
    wk = wkv.reshape(D, H, Dh, 2)[..., 0].reshape(D, D)
    wv = wkv.reshape(D, H, Dh, 2)[..., 1].reshape(D, D)
    bk = bkv.reshape(1, H, Dh, 2)[..., 0].reshape(1, D)
    bv = bkv.reshape(1, H, Dh, 2)[..., 1].reshape(1, D)
    params = (wq, bq, wk, bk, wv, bv, wo, bo, pnw, w1, b1, w2, b2)

    ref = jax.block_until_ready(
        reference(x, latents, wq, bq, wkv, bkv, wo, bo, pnw, w1, b1, w2, b2, H))

    # f32 path (exact softmax reciprocal)
    out_f32 = jax.block_until_ready(
        perceiver_attn(x, latents, params, H, compute_dtype=jnp.float32))
    assert out_f32.shape == (B, K, D)
    assert jnp.allclose(out_f32, ref, atol=1e-2, rtol=1e-2), \
        f"f32 max abs err {jnp.max(jnp.abs(out_f32 - ref))}"

    # bf16 weights/activations with f32 accumulation (fast MXU path)
    out_bf16 = jax.block_until_ready(
        perceiver_attn(x, latents, params, H, compute_dtype=jnp.bfloat16))
    assert out_bf16.shape == (B, K, D)
    assert jnp.allclose(out_bf16, ref, atol=1e-1, rtol=5e-2), \
        f"bf16 max abs err {jnp.max(jnp.abs(out_bf16 - ref))}"

    print("KERNEL_OK")
</pallas_src>

<mosaic_0001>
module attributes {stable_mosaic.version = 11 : i64} {
  func.func @perceiver_attn_kernel(%arg0: i32, %arg1: memref<2x16x128xf32, #tpu.memory_space<vmem>>, %arg2: memref<2x8x128xf32, #tpu.memory_space<vmem>>, %arg3: memref<128x384xf32, #tpu.memory_space<vmem>>, %arg4: memref<1x384xf32, #tpu.memory_space<vmem>>, %arg5: memref<128x256xf32, #tpu.memory_space<vmem>>, %arg6: memref<1x256xf32, #tpu.memory_space<vmem>>, %arg7: memref<128x128xf32, #tpu.memory_space<vmem>>, %arg8: memref<1x128xf32, #tpu.memory_space<vmem>>, %arg9: memref<1x128xf32, #tpu.memory_space<vmem>>, %arg10: memref<128x512xf32, #tpu.memory_space<vmem>>, %arg11: memref<1x512xf32, #tpu.memory_space<vmem>>, %arg12: memref<512x128xf32, #tpu.memory_space<vmem>>, %arg13: memref<1x128xf32, #tpu.memory_space<vmem>>, %arg14: memref<2x8x128xf32, #tpu.memory_space<vmem>>) attributes {dimension_semantics = [#tpu.dimension_semantics<parallel>], iteration_bounds = array<i64: 2>, scalar_prefetch = 0 : i64, scratch_operands = 0 : i64, tpu.core_type = #tpu.core_type<tc>, window_params = [{transform_indices = @transform_0, window_bounds = array<i64: 2, 16, 128>}, {transform_indices = @transform_1, window_bounds = array<i64: 2, 8, 128>}, {pipeline_mode = #tpu.pipeline_mode<synchronous>, transform_indices = @transform_2, window_bounds = array<i64: 128, 384>}, {pipeline_mode = #tpu.pipeline_mode<synchronous>, transform_indices = @transform_3, window_bounds = array<i64: 1, 384>}, {pipeline_mode = #tpu.pipeline_mode<synchronous>, transform_indices = @transform_4, window_bounds = array<i64: 128, 256>}, {pipeline_mode = #tpu.pipeline_mode<synchronous>, transform_indices = @transform_5, window_bounds = array<i64: 1, 256>}, {pipeline_mode = #tpu.pipeline_mode<synchronous>, transform_indices = @transform_6, window_bounds = array<i64: 128, 128>}, {pipeline_mode = #tpu.pipeline_mode<synchronous>, transform_indices = @transform_7, window_bounds = array<i64: 1, 128>}, {pipeline_mode = #tpu.pipeline_mode<synchronous>, transform_indices = @transform_8, window_bounds = array<i64: 1, 128>}, {pipeline_mode = #tpu.pipeline_mode<synchronous>, transform_indices = @transform_9, window_bounds = array<i64: 128, 512>}, {pipeline_mode = #tpu.pipeline_mode<synchronous>, transform_indices = @transform_10, window_bounds = array<i64: 1, 512>}, {pipeline_mode = #tpu.pipeline_mode<synchronous>, transform_indices = @transform_11, window_bounds = array<i64: 512, 128>}, {pipeline_mode = #tpu.pipeline_mode<synchronous>, transform_indices = @transform_12, window_bounds = array<i64: 1, 128>}, {transform_indices = @transform_13, window_bounds = array<i64: 2, 8, 128>}]} {
    %c0 = arith.constant 0 : index
    %c0_0 = arith.constant 0 : index
    %c0_1 = arith.constant 0 : index
    %0 = vector.load %arg1[%c0, %c0_0, %c0_1] : memref<2x16x128xf32, #tpu.memory_space<vmem>>, vector<2x16x128xf32>
    %1 = vector.shape_cast %0 : vector<2x16x128xf32> to vector<32x128xf32>
    %c0_2 = arith.constant 0 : index
    %c0_3 = arith.constant 0 : index
    %c0_4 = arith.constant 0 : index
    %2 = vector.load %arg2[%c0_2, %c0_3, %c0_4] : memref<2x8x128xf32, #tpu.memory_space<vmem>>, vector<2x8x128xf32>
    %3 = vector.shape_cast %2 : vector<2x8x128xf32> to vector<16x128xf32>
    %c0_5 = arith.constant 0 : index
    %c0_6 = arith.constant 0 : index
    %4 = vector.load %arg3[%c0_5, %c0_6] : memref<128x384xf32, #tpu.memory_space<vmem>>, vector<128x384xf32>
    %cst = arith.constant dense<0.000000e+00> : vector<16x384xf32>
    %5 = tpu.matmul %3, %4, %cst {dimension_numbers = #tpu.dot_dimension_numbers<[1], [0], [0], [1], [0, 0, 1, 1], [], []>} : vector<16x128xf32>, vector<128x384xf32>, vector<16x384xf32> -> vector<16x384xf32>
    %c0_7 = arith.constant 0 : index
    %c0_8 = arith.constant 0 : index
    %6 = vector.load %arg4[%c0_7, %c0_8] : memref<1x384xf32, #tpu.memory_space<vmem>>, vector<1x384xf32>
    %7 = vector.broadcast %6 : vector<1x384xf32> to vector<16x384xf32>
    %8 = arith.addf %5, %7 : vector<16x384xf32>
    %c0_9 = arith.constant 0 : index
    %c0_10 = arith.constant 0 : index
    %9 = vector.load %arg5[%c0_9, %c0_10] : memref<128x256xf32, #tpu.memory_space<vmem>>, vector<128x256xf32>
    %cst_11 = arith.constant dense<0.000000e+00> : vector<32x256xf32>
    %10 = tpu.matmul %1, %9, %cst_11 {dimension_numbers = #tpu.dot_dimension_numbers<[1], [0], [0], [1], [0, 0, 1, 1], [], []>} : vector<32x128xf32>, vector<128x256xf32>, vector<32x256xf32> -> vector<32x256xf32>
    %c0_12 = arith.constant 0 : index
    %c0_13 = arith.constant 0 : index
    %11 = vector.load %arg6[%c0_12, %c0_13] : memref<1x256xf32, #tpu.memory_space<vmem>>, vector<1x256xf32>
    %12 = vector.broadcast %11 : vector<1x256xf32> to vector<32x256xf32>
    %13 = arith.addf %10, %12 : vector<32x256xf32>
    %14 = vector.extract_strided_slice %8 {offsets = [0, 0], sizes = [16, 128], strides = [1, 1]} : vector<16x384xf32> to vector<16x128xf32>
    %cst_14 = arith.constant 3.125000e-02 : f32
    %15 = vector.broadcast %cst_14 : f32 to vector<16x128xf32>
    %16 = arith.mulf %14, %15 : vector<16x128xf32>
    %17 = vector.shape_cast %16 : vector<16x128xf32> to vector<2x8x128xf32>
    %18 = vector.extract_strided_slice %8 {offsets = [0, 128], sizes = [16, 128], strides = [1, 1]} : vector<16x384xf32> to vector<16x128xf32>
    %19 = vector.shape_cast %18 : vector<16x128xf32> to vector<2x8x128xf32>
    %20 = vector.extract_strided_slice %8 {offsets = [0, 256], sizes = [16, 128], strides = [1, 1]} : vector<16x384xf32> to vector<16x128xf32>
    %21 = vector.shape_cast %20 : vector<16x128xf32> to vector<2x8x128xf32>
    %22 = vector.extract_strided_slice %13 {offsets = [0, 0], sizes = [32, 128], strides = [1, 1]} : vector<32x256xf32> to vector<32x128xf32>
    %23 = vector.shape_cast %22 : vector<32x128xf32> to vector<2x16x128xf32>
    %24 = vector.extract_strided_slice %13 {offsets = [0, 128], sizes = [32, 128], strides = [1, 1]} : vector<32x256xf32> to vector<32x128xf32>
    %25 = vector.shape_cast %24 : vector<32x128xf32> to vector<2x16x128xf32>
    %26 = vector.extract_strided_slice %17 {offsets = [0, 0, 0], sizes = [2, 8, 32], strides = [1, 1, 1]} : vector<2x8x128xf32> to vector<2x8x32xf32>
    %27 = vector.extract_strided_slice %23 {offsets = [0, 0, 0], sizes = [2, 16, 32], strides = [1, 1, 1]} : vector<2x16x128xf32> to vector<2x16x32xf32>
    "tpu.trace_start"() <{level = 10 : i32, message = "bkd,bpd->bkp"}> : () -> ()
    %cst_15 = arith.constant dense<0.000000e+00> : vector<2x8x16xf32>
    %28 = tpu.matmul %26, %27, %cst_15 {dimension_numbers = #tpu.dot_dimension_numbers<[2], [2], [1], [1], [0, 0, 0, 1, 1, 1], [0], [0]>} : vector<2x8x32xf32>, vector<2x16x32xf32>, vector<2x8x16xf32> -> vector<2x8x16xf32>
    "tpu.trace_stop"() : () -> ()
    %29 = vector.extract_strided_slice %19 {offsets = [0, 0, 0], sizes = [2, 8, 32], strides = [1, 1, 1]} : vector<2x8x128xf32> to vector<2x8x32xf32>
    "tpu.trace_start"() <{level = 10 : i32, message = "bkd,bld->bkl"}> : () -> ()
    %cst_16 = arith.constant dense<0.000000e+00> : vector<2x8x8xf32>
    %30 = tpu.matmul %26, %29, %cst_16 {dimension_numbers = #tpu.dot_dimension_numbers<[2], [2], [1], [1], [0, 0, 0, 1, 1, 1], [0], [0]>} : vector<2x8x32xf32>, vector<2x8x32xf32>, vector<2x8x8xf32> -> vector<2x8x8xf32>
    "tpu.trace_stop"() : () -> ()
    %cst_17 = arith.constant dense<0xFF800000> : vector<2x8xf32>
    %31 = vector.multi_reduction <maximumf>, %28, %cst_17 [2] : vector<2x8x16xf32> to vector<2x8xf32>
    %32 = vector.shape_cast %31 : vector<2x8xf32> to vector<2x8x1xf32>
    %cst_18 = arith.constant dense<0xFF800000> : vector<2x8xf32>
    %33 = vector.multi_reduction <maximumf>, %30, %cst_18 [2] : vector<2x8x8xf32> to vector<2x8xf32>
    %34 = vector.shape_cast %33 : vector<2x8xf32> to vector<2x8x1xf32>
    %35 = arith.maximumf %32, %34 : vector<2x8x1xf32>
    %36 = vector.broadcast %35 : vector<2x8x1xf32> to vector<2x8x16xf32>
    %37 = arith.subf %28, %36 : vector<2x8x16xf32>
    %38 = math.exp %37 : vector<2x8x16xf32>
    %39 = vector.broadcast %35 : vector<2x8x1xf32> to vector<2x8x8xf32>
    %40 = arith.subf %30, %39 : vector<2x8x8xf32>
    %41 = math.exp %40 : vector<2x8x8xf32>
    %cst_19 = arith.constant dense<0.000000e+00> : vector<2x8xf32>
    %42 = vector.multi_reduction <add>, %38, %cst_19 [2] : vector<2x8x16xf32> to vector<2x8xf32>
    %43 = vector.shape_cast %42 : vector<2x8xf32> to vector<2x8x1xf32>
    %cst_20 = arith.constant dense<0.000000e+00> : vector<2x8xf32>
    %44 = vector.multi_reduction <add>, %41, %cst_20 [2] : vector<2x8x8xf32> to vector<2x8xf32>
    %45 = vector.shape_cast %44 : vector<2x8xf32> to vector<2x8x1xf32>
    %46 = arith.addf %43, %45 : vector<2x8x1xf32>
    %47 = vector.extract_strided_slice %25 {offsets = [0, 0, 0], sizes = [2, 16, 32], strides = [1, 1, 1]} : vector<2x16x128xf32> to vector<2x16x32xf32>
    "tpu.trace_start"() <{level = 10 : i32, message = "bkp,bpd->bkd"}> : () -> ()
    %cst_21 = arith.constant dense<0.000000e+00> : vector<2x8x32xf32>
    %48 = tpu.matmul %38, %47, %cst_21 {dimension_numbers = #tpu.dot_dimension_numbers<[2], [1], [1], [2], [0, 0, 0, 1, 1, 2], [0], [0]>} : vector<2x8x16xf32>, vector<2x16x32xf32>, vector<2x8x32xf32> -> vector<2x8x32xf32>
    "tpu.trace_stop"() : () -> ()
    %49 = vector.extract_strided_slice %21 {offsets = [0, 0, 0], sizes = [2, 8, 32], strides = [1, 1, 1]} : vector<2x8x128xf32> to vector<2x8x32xf32>
    "tpu.trace_start"() <{level = 10 : i32, message = "bkl,bld->bkd"}> : () -> ()
    %cst_22 = arith.constant dense<0.000000e+00> : vector<2x8x32xf32>
    %50 = tpu.matmul %41, %49, %cst_22 {dimension_numbers = #tpu.dot_dimension_numbers<[2], [1], [1], [2], [0, 0, 0, 1, 1, 2], [0], [0]>} : vector<2x8x8xf32>, vector<2x8x32xf32>, vector<2x8x32xf32> -> vector<2x8x32xf32>
    "tpu.trace_stop"() : () -> ()
    %51 = arith.addf %48, %50 : vector<2x8x32xf32>
    %52 = tpu.reciprocal %46 : vector<2x8x1xf32> -> vector<2x8x1xf32>
    %53 = vector.broadcast %52 : vector<2x8x1xf32> to vector<2x8x32xf32>
    %54 = arith.mulf %51, %53 : vector<2x8x32xf32>
    %55 = vector.extract_strided_slice %17 {offsets = [0, 0, 32], sizes = [2, 8, 32], strides = [1, 1, 1]} : vector<2x8x128xf32> to vector<2x8x32xf32>
    %56 = vector.extract_strided_slice %23 {offsets = [0, 0, 32], sizes = [2, 16, 32], strides = [1, 1, 1]} : vector<2x16x128xf32> to vector<2x16x32xf32>
    "tpu.trace_start"() <{level = 10 : i32, message = "bkd,bpd->bkp"}> : () -> ()
    %cst_23 = arith.constant dense<0.000000e+00> : vector<2x8x16xf32>
    %57 = tpu.matmul %55, %56, %cst_23 {dimension_numbers = #tpu.dot_dimension_numbers<[2], [2], [1], [1], [0, 0, 0, 1, 1, 1], [0], [0]>} : vector<2x8x32xf32>, vector<2x16x32xf32>, vector<2x8x16xf32> -> vector<2x8x16xf32>
    "tpu.trace_stop"() : () -> ()
    %58 = vector.extract_strided_slice %19 {offsets = [0, 0, 32], sizes = [2, 8, 32], strides = [1, 1, 1]} : vector<2x8x128xf32> to vector<2x8x32xf32>
    "tpu.trace_start"() <{level = 10 : i32, message = "bkd,bld->bkl"}> : () -> ()
    %cst_24 = arith.constant dense<0.000000e+00> : vector<2x8x8xf32>
    %59 = tpu.matmul %55, %58, %cst_24 {dimension_numbers = #tpu.dot_dimension_numbers<[2], [2], [1], [1], [0, 0, 0, 1, 1, 1], [0], [0]>} : vector<2x8x32xf32>, vector<2x8x32xf32>, vector<2x8x8xf32> -> vector<2x8x8xf32>
    "tpu.trace_stop"() : () -> ()
    %cst_25 = arith.constant dense<0xFF800000> : vector<2x8xf32>
    %60 = vector.multi_reduction <maximumf>, %57, %cst_25 [2] : vector<2x8x16xf32> to vector<2x8xf32>
    %61 = vector.shape_cast %60 : vector<2x8xf32> to vector<2x8x1xf32>
    %cst_26 = arith.constant dense<0xFF800000> : vector<2x8xf32>
    %62 = vector.multi_reduction <maximumf>, %59, %cst_26 [2] : vector<2x8x8xf32> to vector<2x8xf32>
    %63 = vector.shape_cast %62 : vector<2x8xf32> to vector<2x8x1xf32>
    %64 = arith.maximumf %61, %63 : vector<2x8x1xf32>
    %65 = vector.broadcast %64 : vector<2x8x1xf32> to vector<2x8x16xf32>
    %66 = arith.subf %57, %65 : vector<2x8x16xf32>
    %67 = math.exp %66 : vector<2x8x16xf32>
    %68 = vector.broadcast %64 : vector<2x8x1xf32> to vector<2x8x8xf32>
    %69 = arith.subf %59, %68 : vector<2x8x8xf32>
    %70 = math.exp %69 : vector<2x8x8xf32>
    %cst_27 = arith.constant dense<0.000000e+00> : vector<2x8xf32>
    %71 = vector.multi_reduction <add>, %67, %cst_27 [2] : vector<2x8x16xf32> to vector<2x8xf32>
    %72 = vector.shape_cast %71 : vector<2x8xf32> to vector<2x8x1xf32>
    %cst_28 = arith.constant dense<0.000000e+00> : vector<2x8xf32>
    %73 = vector.multi_reduction <add>, %70, %cst_28 [2] : vector<2x8x8xf32> to vector<2x8xf32>
    %74 = vector.shape_cast %73 : vector<2x8xf32> to vector<2x8x1xf32>
    %75 = arith.addf %72, %74 : vector<2x8x1xf32>
    %76 = vector.extract_strided_slice %25 {offsets = [0, 0, 32], sizes = [2, 16, 32], strides = [1, 1, 1]} : vector<2x16x128xf32> to vector<2x16x32xf32>
    "tpu.trace_start"() <{level = 10 : i32, message = "bkp,bpd->bkd"}> : () -> ()
    %cst_29 = arith.constant dense<0.000000e+00> : vector<2x8x32xf32>
    %77 = tpu.matmul %67, %76, %cst_29 {dimension_numbers = #tpu.dot_dimension_numbers<[2], [1], [1], [2], [0, 0, 0, 1, 1, 2], [0], [0]>} : vector<2x8x16xf32>, vector<2x16x32xf32>, vector<2x8x32xf32> -> vector<2x8x32xf32>
    "tpu.trace_stop"() : () -> ()
    %78 = vector.extract_strided_slice %21 {offsets = [0, 0, 32], sizes = [2, 8, 32], strides = [1, 1, 1]} : vector<2x8x128xf32> to vector<2x8x32xf32>
    "tpu.trace_start"() <{level = 10 : i32, message = "bkl,bld->bkd"}> : () -> ()
    %cst_30 = arith.constant dense<0.000000e+00> : vector<2x8x32xf32>
    %79 = tpu.matmul %70, %78, %cst_30 {dimension_numbers = #tpu.dot_dimension_numbers<[2], [1], [1], [2], [0, 0, 0, 1, 1, 2], [0], [0]>} : vector<2x8x8xf32>, vector<2x8x32xf32>, vector<2x8x32xf32> -> vector<2x8x32xf32>
    "tpu.trace_stop"() : () -> ()
    %80 = arith.addf %77, %79 : vector<2x8x32xf32>
    %81 = tpu.reciprocal %75 : vector<2x8x1xf32> -> vector<2x8x1xf32>
    %82 = vector.broadcast %81 : vector<2x8x1xf32> to vector<2x8x32xf32>
    %83 = arith.mulf %80, %82 : vector<2x8x32xf32>
    %84 = vector.extract_strided_slice %17 {offsets = [0, 0, 64], sizes = [2, 8, 32], strides = [1, 1, 1]} : vector<2x8x128xf32> to vector<2x8x32xf32>
    %85 = vector.extract_strided_slice %23 {offsets = [0, 0, 64], sizes = [2, 16, 32], strides = [1, 1, 1]} : vector<2x16x128xf32> to vector<2x16x32xf32>
    "tpu.trace_start"() <{level = 10 : i32, message = "bkd,bpd->bkp"}> : () -> ()
    %cst_31 = arith.constant dense<0.000000e+00> : vector<2x8x16xf32>
    %86 = tpu.matmul %84, %85, %cst_31 {dimension_numbers = #tpu.dot_dimension_numbers<[2], [2], [1], [1], [0, 0, 0, 1, 1, 1], [0], [0]>} : vector<2x8x32xf32>, vector<2x16x32xf32>, vector<2x8x16xf32> -> vector<2x8x16xf32>
    "tpu.trace_stop"() : () -> ()
    %87 = vector.extract_strided_slice %19 {offsets = [0, 0, 64], sizes = [2, 8, 32], strides = [1, 1, 1]} : vector<2x8x128xf32> to vector<2x8x32xf32>
    "tpu.trace_start"() <{level = 10 : i32, message = "bkd,bld->bkl"}> : () -> ()
    %cst_32 = arith.constant dense<0.000000e+00> : vector<2x8x8xf32>
    %88 = tpu.matmul %84, %87, %cst_32 {dimension_numbers = #tpu.dot_dimension_numbers<[2], [2], [1], [1], [0, 0, 0, 1, 1, 1], [0], [0]>} : vector<2x8x32xf32>, vector<2x8x32xf32>, vector<2x8x8xf32> -> vector<2x8x8xf32>
    "tpu.trace_stop"() : () -> ()
    %cst_33 = arith.constant dense<0xFF800000> : vector<2x8xf32>
    %89 = vector.multi_reduction <maximumf>, %86, %cst_33 [2] : vector<2x8x16xf32> to vector<2x8xf32>
    %90 = vector.shape_cast %89 : vector<2x8xf32> to vector<2x8x1xf32>
    %cst_34 = arith.constant dense<0xFF800000> : vector<2x8xf32>
    %91 = vector.multi_reduction <maximumf>, %88, %cst_34 [2] : vector<2x8x8xf32> to vector<2x8xf32>
    %92 = vector.shape_cast %91 : vector<2x8xf32> to vector<2x8x1xf32>
    %93 = arith.maximumf %90, %92 : vector<2x8x1xf32>
    %94 = vector.broadcast %93 : vector<2x8x1xf32> to vector<2x8x16xf32>
    %95 = arith.subf %86, %94 : vector<2x8x16xf32>
    %96 = math.exp %95 : vector<2x8x16xf32>
    %97 = vector.broadcast %93 : vector<2x8x1xf32> to vector<2x8x8xf32>
    %98 = arith.subf %88, %97 : vector<2x8x8xf32>
    %99 = math.exp %98 : vector<2x8x8xf32>
    %cst_35 = arith.constant dense<0.000000e+00> : vector<2x8xf32>
    %100 = vector.multi_reduction <add>, %96, %cst_35 [2] : vector<2x8x16xf32> to vector<2x8xf32>
    %101 = vector.shape_cast %100 : vector<2x8xf32> to vector<2x8x1xf32>
    %cst_36 = arith.constant dense<0.000000e+00> : vector<2x8xf32>
    %102 = vector.multi_reduction <add>, %99, %cst_36 [2] : vector<2x8x8xf32> to vector<2x8xf32>
    %103 = vector.shape_cast %102 : vector<2x8xf32> to vector<2x8x1xf32>
    %104 = arith.addf %101, %103 : vector<2x8x1xf32>
    %105 = vector.extract_strided_slice %25 {offsets = [0, 0, 64], sizes = [2, 16, 32], strides = [1, 1, 1]} : vector<2x16x128xf32> to vector<2x16x32xf32>
    "tpu.trace_start"() <{level = 10 : i32, message = "bkp,bpd->bkd"}> : () -> ()
    %cst_37 = arith.constant dense<0.000000e+00> : vector<2x8x32xf32>
    %106 = tpu.matmul %96, %105, %cst_37 {dimension_numbers = #tpu.dot_dimension_numbers<[2], [1], [1], [2], [0, 0, 0, 1, 1, 2], [0], [0]>} : vector<2x8x16xf32>, vector<2x16x32xf32>, vector<2x8x32xf32> -> vector<2x8x32xf32>
    "tpu.trace_stop"() : () -> ()
    %107 = vector.extract_strided_slice %21 {offsets = [0, 0, 64], sizes = [2, 8, 32], strides = [1, 1, 1]} : vector<2x8x128xf32> to vector<2x8x32xf32>
    "tpu.trace_start"() <{level = 10 : i32, message = "bkl,bld->bkd"}> : () -> ()
    %cst_38 = arith.constant dense<0.000000e+00> : vector<2x8x32xf32>
    %108 = tpu.matmul %99, %107, %cst_38 {dimension_numbers = #tpu.dot_dimension_numbers<[2], [1], [1], [2], [0, 0, 0, 1, 1, 2], [0], [0]>} : vector<2x8x8xf32>, vector<2x8x32xf32>, vector<2x8x32xf32> -> vector<2x8x32xf32>
    "tpu.trace_stop"() : () -> ()
    %109 = arith.addf %106, %108 : vector<2x8x32xf32>
    %110 = tpu.reciprocal %104 : vector<2x8x1xf32> -> vector<2x8x1xf32>
    %111 = vector.broadcast %110 : vector<2x8x1xf32> to vector<2x8x32xf32>
    %112 = arith.mulf %109, %111 : vector<2x8x32xf32>
    %113 = vector.extract_strided_slice %17 {offsets = [0, 0, 96], sizes = [2, 8, 32], strides = [1, 1, 1]} : vector<2x8x128xf32> to vector<2x8x32xf32>
    %114 = vector.extract_strided_slice %23 {offsets = [0, 0, 96], sizes = [2, 16, 32], strides = [1, 1, 1]} : vector<2x16x128xf32> to vector<2x16x32xf32>
    "tpu.trace_start"() <{level = 10 : i32, message = "bkd,bpd->bkp"}> : () -> ()
    %cst_39 = arith.constant dense<0.000000e+00> : vector<2x8x16xf32>
    %115 = tpu.matmul %113, %114, %cst_39 {dimension_numbers = #tpu.dot_dimension_numbers<[2], [2], [1], [1], [0, 0, 0, 1, 1, 1], [0], [0]>} : vector<2x8x32xf32>, vector<2x16x32xf32>, vector<2x8x16xf32> -> vector<2x8x16xf32>
    "tpu.trace_stop"() : () -> ()
    %116 = vector.extract_strided_slice %19 {offsets = [0, 0, 96], sizes = [2, 8, 32], strides = [1, 1, 1]} : vector<2x8x128xf32> to vector<2x8x32xf32>
    "tpu.trace_start"() <{level = 10 : i32, message = "bkd,bld->bkl"}> : () -> ()
    %cst_40 = arith.constant dense<0.000000e+00> : vector<2x8x8xf32>
    %117 = tpu.matmul %113, %116, %cst_40 {dimension_numbers = #tpu.dot_dimension_numbers<[2], [2], [1], [1], [0, 0, 0, 1, 1, 1], [0], [0]>} : vector<2x8x32xf32>, vector<2x8x32xf32>, vector<2x8x8xf32> -> vector<2x8x8xf32>
    "tpu.trace_stop"() : () -> ()
    %cst_41 = arith.constant dense<0xFF800000> : vector<2x8xf32>
    %118 = vector.multi_reduction <maximumf>, %115, %cst_41 [2] : vector<2x8x16xf32> to vector<2x8xf32>
    %119 = vector.shape_cast %118 : vector<2x8xf32> to vector<2x8x1xf32>
    %cst_42 = arith.constant dense<0xFF800000> : vector<2x8xf32>
    %120 = vector.multi_reduction <maximumf>, %117, %cst_42 [2] : vector<2x8x8xf32> to vector<2x8xf32>
    %121 = vector.shape_cast %120 : vector<2x8xf32> to vector<2x8x1xf32>
    %122 = arith.maximumf %119, %121 : vector<2x8x1xf32>
    %123 = vector.broadcast %122 : vector<2x8x1xf32> to vector<2x8x16xf32>
    %124 = arith.subf %115, %123 : vector<2x8x16xf32>
    %125 = math.exp %124 : vector<2x8x16xf32>
    %126 = vector.broadcast %122 : vector<2x8x1xf32> to vector<2x8x8xf32>
    %127 = arith.subf %117, %126 : vector<2x8x8xf32>
    %128 = math.exp %127 : vector<2x8x8xf32>
    %cst_43 = arith.constant dense<0.000000e+00> : vector<2x8xf32>
    %129 = vector.multi_reduction <add>, %125, %cst_43 [2] : vector<2x8x16xf32> to vector<2x8xf32>
    %130 = vector.shape_cast %129 : vector<2x8xf32> to vector<2x8x1xf32>
    %cst_44 = arith.constant dense<0.000000e+00> : vector<2x8xf32>
    %131 = vector.multi_reduction <add>, %128, %cst_44 [2] : vector<2x8x8xf32> to vector<2x8xf32>
    %132 = vector.shape_cast %131 : vector<2x8xf32> to vector<2x8x1xf32>
    %133 = arith.addf %130, %132 : vector<2x8x1xf32>
    %134 = vector.extract_strided_slice %25 {offsets = [0, 0, 96], sizes = [2, 16, 32], strides = [1, 1, 1]} : vector<2x16x128xf32> to vector<2x16x32xf32>
    "tpu.trace_start"() <{level = 10 : i32, message = "bkp,bpd->bkd"}> : () -> ()
    %cst_45 = arith.constant dense<0.000000e+00> : vector<2x8x32xf32>
    %135 = tpu.matmul %125, %134, %cst_45 {dimension_numbers = #tpu.dot_dimension_numbers<[2], [1], [1], [2], [0, 0, 0, 1, 1, 2], [0], [0]>} : vector<2x8x16xf32>, vector<2x16x32xf32>, vector<2x8x32xf32> -> vector<2x8x32xf32>
    "tpu.trace_stop"() : () -> ()
    %136 = vector.extract_strided_slice %21 {offsets = [0, 0, 96], sizes = [2, 8, 32], strides = [1, 1, 1]} : vector<2x8x128xf32> to vector<2x8x32xf32>
    "tpu.trace_start"() <{level = 10 : i32, message = "bkl,bld->bkd"}> : () -> ()
    %cst_46 = arith.constant dense<0.000000e+00> : vector<2x8x32xf32>
    %137 = tpu.matmul %128, %136, %cst_46 {dimension_numbers = #tpu.dot_dimension_numbers<[2], [1], [1], [2], [0, 0, 0, 1, 1, 2], [0], [0]>} : vector<2x8x8xf32>, vector<2x8x32xf32>, vector<2x8x32xf32> -> vector<2x8x32xf32>
    "tpu.trace_stop"() : () -> ()
    %138 = arith.addf %135, %137 : vector<2x8x32xf32>
    %139 = tpu.reciprocal %133 : vector<2x8x1xf32> -> vector<2x8x1xf32>
    %140 = vector.broadcast %139 : vector<2x8x1xf32> to vector<2x8x32xf32>
    %141 = arith.mulf %138, %140 : vector<2x8x32xf32>
    %142 = tpu.concatenate %54, %83, %112, %141 in 2 : vector<2x8x32xf32>, vector<2x8x32xf32>, vector<2x8x32xf32>, vector<2x8x32xf32> -> vector<2x8x128xf32>
    %143 = vector.shape_cast %142 : vector<2x8x128xf32> to vector<16x128xf32>
    %c0_47 = arith.constant 0 : index
    %c0_48 = arith.constant 0 : index
    %144 = vector.load %arg7[%c0_47, %c0_48] : memref<128x128xf32, #tpu.memory_space<vmem>>, vector<128x128xf32>
    %cst_49 = arith.constant dense<0.000000e+00> : vector<16x128xf32>
    %145 = tpu.matmul %143, %144, %cst_49 {dimension_numbers = #tpu.dot_dimension_numbers<[1], [0], [0], [1], [0, 0, 1, 1], [], []>} : vector<16x128xf32>, vector<128x128xf32>, vector<16x128xf32> -> vector<16x128xf32>
    %c0_50 = arith.constant 0 : index
    %c0_51 = arith.constant 0 : index
    %146 = vector.load %arg8[%c0_50, %c0_51] : memref<1x128xf32, #tpu.memory_space<vmem>>, vector<1x128xf32>
    %147 = vector.broadcast %146 : vector<1x128xf32> to vector<16x128xf32>
    %148 = arith.addf %145, %147 : vector<16x128xf32>
    %149 = arith.addf %148, %3 : vector<16x128xf32>
    %150 = arith.mulf %149, %149 : vector<16x128xf32>
    %cst_52 = arith.constant dense<0.000000e+00> : vector<16xf32>
    %151 = vector.multi_reduction <add>, %150, %cst_52 [1] : vector<16x128xf32> to vector<16xf32>
    %152 = vector.shape_cast %151 : vector<16xf32> to vector<16x1xf32>
    %cst_53 = arith.constant 1.280000e+02 : f32
    %153 = vector.broadcast %cst_53 : f32 to vector<16x1xf32>
    %154 = arith.divf %152, %153 : vector<16x1xf32>
    %cst_54 = arith.constant 9.99999997E-7 : f32
    %155 = vector.broadcast %cst_54 : f32 to vector<16x1xf32>
    %156 = arith.addf %154, %155 : vector<16x1xf32>
    %157 = math.rsqrt %156 : vector<16x1xf32>
    %158 = vector.broadcast %157 : vector<16x1xf32> to vector<16x128xf32>
    %159 = arith.mulf %149, %158 : vector<16x128xf32>
    %c0_55 = arith.constant 0 : index
    %c0_56 = arith.constant 0 : index
    %160 = vector.load %arg9[%c0_55, %c0_56] : memref<1x128xf32, #tpu.memory_space<vmem>>, vector<1x128xf32>
    %161 = vector.broadcast %160 : vector<1x128xf32> to vector<16x128xf32>
    %162 = arith.mulf %159, %161 : vector<16x128xf32>
    %c0_57 = arith.constant 0 : index
    %c0_58 = arith.constant 0 : index
    %163 = vector.load %arg10[%c0_57, %c0_58] : memref<128x512xf32, #tpu.memory_space<vmem>>, vector<128x512xf32>
    %cst_59 = arith.constant dense<0.000000e+00> : vector<16x512xf32>
    %164 = tpu.matmul %162, %163, %cst_59 {dimension_numbers = #tpu.dot_dimension_numbers<[1], [0], [0], [1], [0, 0, 1, 1], [], []>} : vector<16x128xf32>, vector<128x512xf32>, vector<16x512xf32> -> vector<16x512xf32>
    %c0_60 = arith.constant 0 : index
    %c0_61 = arith.constant 0 : index
    %165 = vector.load %arg11[%c0_60, %c0_61] : memref<1x512xf32, #tpu.memory_space<vmem>>, vector<1x512xf32>
    %166 = vector.broadcast %165 : vector<1x512xf32> to vector<16x512xf32>
    %167 = arith.addf %164, %166 : vector<16x512xf32>
    %168 = arith.mulf %167, %167 : vector<16x512xf32>
    %169 = arith.mulf %167, %168 : vector<16x512xf32>
    %cst_62 = arith.constant 4.471500e-02 : f32
    %170 = vector.broadcast %cst_62 : f32 to vector<16x512xf32>
    %171 = arith.mulf %170, %169 : vector<16x512xf32>
    %172 = arith.addf %167, %171 : vector<16x512xf32>
    %cst_63 = arith.constant 0.797884583 : f32
    %173 = vector.broadcast %cst_63 : f32 to vector<16x512xf32>
    %174 = arith.mulf %173, %172 : vector<16x512xf32>
    %175 = math.tanh %174 : vector<16x512xf32>
    %cst_64 = arith.constant 1.000000e+00 : f32
    %176 = vector.broadcast %cst_64 : f32 to vector<16x512xf32>
    %177 = arith.addf %176, %175 : vector<16x512xf32>
    %cst_65 = arith.constant 5.000000e-01 : f32
    %178 = vector.broadcast %cst_65 : f32 to vector<16x512xf32>
    %179 = arith.mulf %178, %177 : vector<16x512xf32>
    %180 = arith.mulf %167, %179 : vector<16x512xf32>
    %c0_66 = arith.constant 0 : index
    %c0_67 = arith.constant 0 : index
    %181 = vector.load %arg12[%c0_66, %c0_67] : memref<512x128xf32, #tpu.memory_space<vmem>>, vector<512x128xf32>
    %cst_68 = arith.constant dense<0.000000e+00> : vector<16x128xf32>
    %182 = tpu.matmul %180, %181, %cst_68 {dimension_numbers = #tpu.dot_dimension_numbers<[1], [0], [0], [1], [0, 0, 1, 1], [], []>} : vector<16x512xf32>, vector<512x128xf32>, vector<16x128xf32> -> vector<16x128xf32>
    %c0_69 = arith.constant 0 : index
    %c0_70 = arith.constant 0 : index
    %183 = vector.load %arg13[%c0_69, %c0_70] : memref<1x128xf32, #tpu.memory_space<vmem>>, vector<1x128xf32>
    %184 = vector.broadcast %183 : vector<1x128xf32> to vector<16x128xf32>
    %185 = arith.addf %182, %184 : vector<16x128xf32>
    %186 = arith.addf %185, %3 : vector<16x128xf32>
    %187 = vector.shape_cast %186 : vector<16x128xf32> to vector<2x8x128xf32>
    %c0_71 = arith.constant 0 : index
    %c0_72 = arith.constant 0 : index
    %c0_73 = arith.constant 0 : index
    %188 = vector.load %arg14[%c0_71, %c0_72, %c0_73] : memref<2x8x128xf32, #tpu.memory_space<vmem>>, vector<2x8x128xf32>
    tpu.vector_store %arg14[%c0_71, %c0_72, %c0_73], %187 {strides = array<i32>} : memref<2x8x128xf32, #tpu.memory_space<vmem>>, vector<2x8x128xf32>,
    return
  }
  func.func @transform_0(%arg0: i32) -> (i32, i32, i32) {
    %c0_i32 = arith.constant 0 : i32
    %c0_i32_0 = arith.constant 0 : i32
    %c0_i32_1 = arith.constant 0 : i32
    return %arg0, %c0_i32, %c0_i32_0 : i32, i32, i32
  }
  func.func @transform_1(%arg0: i32) -> (i32, i32, i32) {
    %c0_i32 = arith.constant 0 : i32
    %c0_i32_0 = arith.constant 0 : i32
    %c0_i32_1 = arith.constant 0 : i32
    return %arg0, %c0_i32, %c0_i32_0 : i32, i32, i32
  }
  func.func @transform_2(%arg0: i32) -> (i32, i32) {
    %c0_i32 = arith.constant 0 : i32
    %c0_i32_0 = arith.constant 0 : i32
    %c0_i32_1 = arith.constant 0 : i32
    return %c0_i32, %c0_i32_0 : i32, i32
  }
  func.func @transform_3(%arg0: i32) -> (i32, i32) {
    %c0_i32 = arith.constant 0 : i32
    %c0_i32_0 = arith.constant 0 : i32
    %c0_i32_1 = arith.constant 0 : i32
    return %c0_i32, %c0_i32_0 : i32, i32
  }
  func.func @transform_4(%arg0: i32) -> (i32, i32) {
    %c0_i32 = arith.constant 0 : i32
    %c0_i32_0 = arith.constant 0 : i32
    %c0_i32_1 = arith.constant 0 : i32
    return %c0_i32, %c0_i32_0 : i32, i32
  }
  func.func @transform_5(%arg0: i32) -> (i32, i32) {
    %c0_i32 = arith.constant 0 : i32
    %c0_i32_0 = arith.constant 0 : i32
    %c0_i32_1 = arith.constant 0 : i32
    return %c0_i32, %c0_i32_0 : i32, i32
  }
  func.func @transform_6(%arg0: i32) -> (i32, i32) {
    %c0_i32 = arith.constant 0 : i32
    %c0_i32_0 = arith.constant 0 : i32
    %c0_i32_1 = arith.constant 0 : i32
    return %c0_i32, %c0_i32_0 : i32, i32
  }
  func.func @transform_7(%arg0: i32) -> (i32, i32) {
    %c0_i32 = arith.constant 0 : i32
    %c0_i32_0 = arith.constant 0 : i32
    %c0_i32_1 = arith.constant 0 : i32
    return %c0_i32, %c0_i32_0 : i32, i32
  }
  func.func @transform_8(%arg0: i32) -> (i32, i32) {
    %c0_i32 = arith.constant 0 : i32
    %c0_i32_0 = arith.constant 0 : i32
    %c0_i32_1 = arith.constant 0 : i32
    return %c0_i32, %c0_i32_0 : i32, i32
  }
  func.func @transform_9(%arg0: i32) -> (i32, i32) {
    %c0_i32 = arith.constant 0 : i32
    %c0_i32_0 = arith.constant 0 : i32
    %c0_i32_1 = arith.constant 0 : i32
    return %c0_i32, %c0_i32_0 : i32, i32
  }
  func.func @transform_10(%arg0: i32) -> (i32, i32) {
    %c0_i32 = arith.constant 0 : i32
    %c0_i32_0 = arith.constant 0 : i32
    %c0_i32_1 = arith.constant 0 : i32
    return %c0_i32, %c0_i32_0 : i32, i32
  }
  func.func @transform_11(%arg0: i32) -> (i32, i32) {
    %c0_i32 = arith.constant 0 : i32
    %c0_i32_0 = arith.constant 0 : i32
    %c0_i32_1 = arith.constant 0 : i32
    return %c0_i32, %c0_i32_0 : i32, i32
  }
  func.func @transform_12(%arg0: i32) -> (i32, i32) {
    %c0_i32 = arith.constant 0 : i32
    %c0_i32_0 = arith.constant 0 : i32
    %c0_i32_1 = arith.constant 0 : i32
    return %c0_i32, %c0_i32_0 : i32, i32
  }
  func.func @transform_13(%arg0: i32) -> (i32, i32, i32) {
    %c0_i32 = arith.constant 0 : i32
    %c0_i32_0 = arith.constant 0 : i32
    %c0_i32_1 = arith.constant 0 : i32
    return %arg0, %c0_i32, %c0_i32_0 : i32, i32, i32
  }
}

</mosaic_0001>

<bundles_post_ra>
// kernel: tpu_custom_call.1
= control target key start
LH: loop header
LB: loop body
LE: loop exit
PB: predicated region body
PF: predicated region fallthrough
CT: control target
= control target key end

     0   :  { %s6374_s0 = inlined_call_operand.hbm [shape: f32[4,16,128], index: 0, kind: input, shape index: {}]   ;;  %s6375_s1 = inlined_call_operand.hbm [shape: f32[4,8,128], index: 1, kind: input, shape index: {}]   ;;  %s6376_s2 = inlined_call_operand.hbm [shape: f32[128,384], index: 2, kind: input, shape index: {}]   ;;  %s6377_s3 = inlined_call_operand.vmem [shape: f32[1,384], index: 3, kind: input, shape index: {}]   ;;  %s6378_s4 = inlined_call_operand.hbm [shape: f32[128,256], index: 4, kind: input, shape index: {}]   ;;  %s6379_s5 = inlined_call_operand.vmem [shape: f32[1,256], index: 5, kind: input, shape index: {}]   ;;  %s6380_s6 = inlined_call_operand.hbm [shape: f32[128,128], index: 6, kind: input, shape index: {}]   ;;  %s6381_s7 = inlined_call_operand.vmem [shape: f32[1,128], index: 7, kind: input, shape index: {}]   ;;  %s6382_s8 = inlined_call_operand.vmem [shape: f32[1,128], index: 8, kind: input, shape index: {}]   ;;  %s6383_s9 = inlined_call_operand.hbm [shape: f32[128,512], index: 9, kind: input, shape index: {}]   ;;  %s6384_s10 = inlined_call_operand.vmem [shape: f32[1,512], index: 10, kind: input, shape index: {}]   ;;  %s6385_s11 = inlined_call_operand.hbm [shape: f32[512,128], index: 11, kind: input, shape index: {}]   ;;  %s6386_s12 = inlined_call_operand.vmem [shape: f32[1,128], index: 12, kind: input, shape index: {}]   ;;  %s6387_s13 = inlined_call_operand.hbm [shape: f32[4,8,128], index: 13, kind: output, shape index: {}]  }
   0x1   :  { %6400 = sst [smem:[#allocation25_spill]] %s6374_s0 }
   0x2   :  { %6401 = sst [smem:[#allocation26_spill]] %s6376_s2 }
   0x3   :  { %6402 = sst [smem:[#allocation27_spill]] %s6378_s4 }
   0x4   :  { %6403 = sst [smem:[#allocation28_spill]] %s6380_s6 }
   0x5   :  { %6404 = sst [smem:[#allocation29_spill]] %s6383_s9 }
   0x6   :  { %6405 = sst [smem:[#allocation30_spill]] %s6385_s11 }
   0x7   :  { %6406 = sst [smem:[#allocation31_spill]] %s6387_s13 }
   0x8   :  { %18 = vsyncpa [#allocation3], 0 }
   0x9   :  { %20 = vsyncpa [#allocation3 + $0x1], 0 }
   0xa   :  { %21 = vsyncpa [#allocation6], 0 }
   0xb   :  { %23 = vsyncpa [#allocation6 + $0x1], 0 }
   0xc   :  { %24 = vsyncpa [#allocation9], 0 }
   0xd   :  { %25 = vsyncpa [#allocation12], 0 }
   0xe   :  { %26 = vsyncpa [#allocation4], 0 }
   0xf   :  { %28 = vsyncpa [#allocation4 + $0x1], 0  ;;  %s5539_s25 = smov 0   ;;  %s5541_s26 = smov 0  }
  0x10   :  { %s5543_s27 = smov 0   ;;  %s5545_s28 = smov 0  }
  0x11 LB: > { %6407 = sst [smem:[#allocation21_spill]] %s5440_s27  ;;  %s5446_s29 = smov [#allocation7]   ;;  %s5444_s28 = sphi %s5545_s28, %s6440_s28   ;;  %s5440_s27 = sphi %s5543_s27, %s6442_s27   ;;  %s5436_s26 = sphi %s5541_s26, %s6444_s26   ;;  %s5432_s25 = sphi %s5539_s25, %s6443_s25  }
  0x12   : > { %s360_s30 = sshll.u32 %s5446_s29, 4  ;;  %s5560_s14 = sadd.s32 4294967295, %s5444_s28   ;;  %s361_s30 = int_to_ptr.vmem [resolvable:$true] %s360_s30 }
  0x13   : > { %p4431_p0 = scmp.ge.s32.totalorder %s5444_s28, 1  ;;  %p6393_p1 = scmp.eq.s32.totalorder %s5560_s14, 0 }
  0x14   : > { %p348_p2 = scmp.lt.s32.totalorder %s5444_s28, 3  ;;  %s5447_s16 = smov [#allocation8]  }
  0x15   : > { %s376_s17 = sshll.u32 %s5447_s16, 4  ;;  %s5448_s19 = smov [#allocation11]   ;;  %s5578_s17 = int_to_ptr.vmem [resolvable:$true] %s376_s17 }
  0x16   : > { %p5565_p3 = pnand %p4431_p0, %p348_p2  ;;  %s5580_s20 = sshll.u32 %s5448_s19, 4  ;;  %s412_s20 = int_to_ptr.vmem [resolvable:$true] %s5580_s20 }
  0x17   : > { %s5189_s22 = scalar_lea.vmem %s361_s30, 6144  ;;  %p5197_p11 = scmp.lt.s32.totalorder %s361_s30, %s361_s30 }
  0x18   : > { %p5002_p5 = pneg %p5565_p3  ;;  %p5190_p8 = scmp.ne.s32.totalorder %s361_s30, %s5189_s22 }
  0x19   : > { %p5198_p12 = scmp.lt.s32.totalorder %s5189_s22, %s5189_s22 }
  0x1a   : > { %p5574_p6 = pnand %p5002_p5, %p6393_p1 }
  0x1b   : > { %p5199_p13 = por %p5198_p12, %p5197_p11 }
  0x1c   : > { %p5584_p7 = pneg %p5574_p6 }
  0x1e   : > { %p5192_p9 = pnand %p5190_p8, %p5584_p7 }
  0x20   : > { %p5193_p10 = pneg %p5192_p9 }
  0x22   : > { %p5200_p0 = pnand %p5199_p13, %p5193_p10 }
  0x24   : > { %5203 = shalt.err (!%p5200_p0)
}
  0x25   : > { %s5449_s23 = smov 384   ;;  %s5450_s24 = smov 24  }
  0x26   : > { %s6411_s2 = sld [smem:[#allocation26_spill]]  ;;  %s5215_s19 = scalar_lea.vmem %s5578_s17, 4096 }
  0x27   : > { %p5216_p2 = scmp.ne.s32.totalorder %s5578_s17, %s5215_s19  ;;  %p5223_p9 = scmp.lt.s32.totalorder %s5578_s17, %s5578_s17 }
  0x28   : > { %p5224_p10 = scmp.lt.s32.totalorder %s5215_s19, %s5215_s19 }
  0x29   : > { %p5218_p5 = pnand %p5216_p2, %p5584_p7 }
  0x2a   : > { %p5225_p11 = por %p5224_p10, %p5223_p9 }
  0x2b   : > { %p5219_p8 = pneg %p5218_p5 }
  0x2c   : > { %5005 = dma.hbm_to_vmem [thread:$0]  (!%p5574_p6), %s6411_s2, 6144, %s361_s30, [#allocation6], %s5449_s23, %s5449_s23, %s5450_s24  }
  0x2d   : > { %p5226_p12 = pnand %p5225_p11, %p5219_p8 }
  0x2f   : > { %5229 = shalt.err (!%p5226_p12)
}
  0x30   : > { %s5451_s22 = smov 256   ;;  %s5452_s13 = smov 16  }
  0x31   : > { %s6412_s4 = sld [smem:[#allocation27_spill]]  ;;  %s5241_s23 = scalar_lea.vmem %s412_s20, 8192 }
  0x32   : > { %p5242_p13 = scmp.ne.s32.totalorder %s412_s20, %s5241_s23  ;;  %p5249_p5 = scmp.lt.s32.totalorder %s412_s20, %s412_s20 }
  0x33   : > { %p5250_p8 = scmp.lt.s32.totalorder %s5241_s23, %s5241_s23 }
  0x34   : > { %p5244_p0 = pnand %p5242_p13, %p5584_p7 }
  0x35   : > { %p5251_p9 = por %p5250_p8, %p5249_p5 }
  0x36   : > { %p5245_p2 = pneg %p5244_p0 }
  0x37   : > { %5008 = dma.hbm_to_vmem [thread:$0]  (!%p5574_p6), %s6412_s4, 4096, %s5578_s17, [#allocation9], %s5451_s22, %s5451_s22, %s5452_s13  }
  0x38   : > { %p5252_p10 = pnand %p5251_p9, %p5245_p2 }
  0x3a   : > { %5255 = shalt.err (!%p5252_p10)
}
  0x3b   : > { %s5453_s24 = smov 512   ;;  %s5454_s16 = smov 32  }
  0x3c   : > { %s6413_s9 = sld [smem:[#allocation29_spill]]  ;;  %s5455_s13 = smov [#allocation10]  }
  0x3d   : > { %s392_s17 = sshll.u32 %s5455_s13, 4  ;;  %s393_s17 = int_to_ptr.vmem [resolvable:$true] %s392_s17 }
  0x3e   : > { %s5267_s22 = scalar_lea.vmem %s393_s17, 2048  ;;  %p5275_p0 = scmp.lt.s32.totalorder %s393_s17, %s393_s17 }
  0x3f   : > { %p5268_p11 = scmp.ne.s32.totalorder %s393_s17, %s5267_s22  ;;  %p5276_p2 = scmp.lt.s32.totalorder %s5267_s22, %s5267_s22 }
  0x41   : > { %p5270_p12 = pnand %p5268_p11, %p5584_p7  ;;  %p5277_p5 = por %p5276_p2, %p5275_p0 }
  0x42   : > { %5014 = dma.hbm_to_vmem [thread:$0]  (!%p5574_p6), %s6413_s9, 8192, %s412_s20, [#allocation12], %s5453_s24, %s5453_s24, %s5454_s16  }
  0x43   : > { %p5271_p13 = pneg %p5270_p12 }
  0x45   : > { %p5278_p8 = pnand %p5277_p5, %p5271_p13 }
  0x47   : > { %5281 = shalt.err (!%p5278_p8)
}
  0x48   : > { %s6389_s29 = smov 128   ;;  %s6391_s30 = smov 8  }
  0x49   : > { %s6414_s6 = sld [smem:[#allocation28_spill]]  ;;  %s5458_s23 = smov [#allocation13]  }
  0x4a   : > { %s427_s24 = sshll.u32 %s5458_s23, 4  ;;  %s428_s24 = int_to_ptr.vmem [resolvable:$true] %s427_s24 }
  0x4b   : > { %s5293_s16 = scalar_lea.vmem %s428_s24, 8192  ;;  %p5301_p12 = scmp.lt.s32.totalorder %s428_s24, %s428_s24 }
  0x4c   : > { %p5294_p9 = scmp.ne.s32.totalorder %s428_s24, %s5293_s16  ;;  %p5302_p13 = scmp.lt.s32.totalorder %s5293_s16, %s5293_s16 }
  0x4e   : > { %p5296_p10 = pnand %p5294_p9, %p5584_p7  ;;  %p5303_p0 = por %p5302_p13, %p5301_p12 }
  0x4f   : > { %5011 = dma.hbm_to_vmem [thread:$0]  (!%p5574_p6), %s6414_s6, 2048, %s393_s17, [#allocation9], %s6389_s29, %s6389_s29, %s6391_s30  }
  0x50   : > { %p5297_p11 = pneg %p5296_p10 }
  0x52   : > { %p5304_p2 = pnand %p5303_p0, %p5297_p11 }
  0x54   : > { %5307 = shalt.err (!%p5304_p2)
}
  0x55   : > { %s6415_s11 = sld [smem:[#allocation30_spill]]  ;;  %s4430_s18 = sadd.s32 4294967294, %s5444_s28  }
  0x56   : > { %s5637_s21 = sadd.s32 1, %s5444_s28   ;;  %s41_s17 = sadd.s32 1, %s5440_s27 }
  0x57   : > { %6416 = sst [smem:[#allocation22_spill]] %s5637_s21  ;;  %s38_s22 = ssub.s32 %s5444_s28, %s5637_s21 }
  0x58   : > { %p48_p7 = scmp.ne.s32.totalorder %s5440_s27, %s5436_s26  ;;  %p39_p5 = scmp.eq.s32.totalorder %s38_s22, 0 }
  0x59   : > { %p49_p8 = scmp.eq.s32.totalorder %s5444_s28, 0  ;;  %p54_p9 = scmp.ne.s32.totalorder %s5436_s26, %s5432_s25 }
  0x5a   : > { %p335_p10 = scmp.eq.s32.totalorder %s5560_s14, 1  ;;  %p341_p13 = scmp.eq.s32.totalorder %s4430_s18, 1 }
  0x5b   : > { %5017 = dma.hbm_to_vmem [thread:$0]  (!%p5574_p6), %s6415_s11, 8192, %s428_s24, [#allocation12], %s6389_s29, %s6389_s29, %s6391_s30  }
  0x5c   : > { %s5649_s2 = scalar_select %p39_p5, %s5440_s27, %s41_s17  }
  0x5d   : > { %p50_p11 = por %p49_p8, %p48_p7  ;;  %p5653_p12 = por %p6393_p1, %p54_p9 }
  0x5e   : > { %6417 = sst [smem:[#allocation23_spill]] %s5649_s2  ;;  %p5657_p6 = por %p335_p10, %p48_p7 }
  0x5f   : > { %s6418_s20 = scalar_select %p5653_p12, 1, 0 }
  0x60   : > { %s6419_s23 = scalar_select %p5657_p6, 1, 0 }
  0x61   : > { %p5034_p0 = scmp.lt.s32.totalorder %s5444_s28, 2  ;;  %s5663_s24 = sand.u32 1, %s5440_s27  }
  0x62   : > { %p5665_p2 = por %p341_p13, %p54_p9  ;;  %s4438_s19 = sshll.u32 %s5663_s24, 5 }
  0x63   : > { %s4519_s13 = sshll.u32 %s5444_s28, 9  ;;  %s6422_s0 = sld [smem:[#allocation25_spill]] }
  0x64   : > { %s6420_s16 = scalar_select %p5665_p2, 1, 0 }
  0x65   : > { %s448_s18 = scalar_lea.vmem [#allocation2], %s4438_s19  ;;  %p5676_p7 = pnand %p5034_p0, %p50_p11 }
  0x66   : > { %6421 = sst [smem:[#allocation24_spill]] %s6420_s16  ;;  %s456_s30 = sshll.u32 %s448_s18, 4  ;;  %s5680_s30 = int_to_ptr.vmem [resolvable:$true] %s456_s30 }
  0x67   : > { %p5310_p8 = pneg %p5676_p7 }
  0x69   : > { %s5674_s29 = scalar_lea.hbm %s6422_s0, %s4519_s13  ;;  %s5313_s17 = scalar_lea.hbm %s6422_s0, 1024 }
  0x6a   : > { %s5308_s11 = scalar_lea.hbm %s5674_s29, 512  ;;  %p5314_p11 = scmp.lt.s32.totalorder %s5674_s29, %s6422_s0 }
  0x6b   : > { %p5309_p5 = scmp.ne.s32.totalorder %s5674_s29, %s5308_s11  ;;  %p5315_p13 = scmp.lt.s32.totalorder %s5313_s17, %s5308_s11 }
  0x6d   : > { %p5311_p9 = pnand %p5310_p8, %p5309_p5  ;;  %p5316_p0 = por %p5315_p13, %p5314_p11 }
  0x6f   : > { %p5312_p10 = pneg %p5311_p9 }
  0x71   : > { %p5317_p4 = pnand %p5316_p0, %p5312_p10 }
  0x73   : > { %5320 = shalt.err (!%p5317_p4)
}
  0x74   : > { %s5321_s6 = scalar_lea.vmem %s5680_s30, 512  ;;  %s5459_s19 = smov [#allocation2]  }
  0x75   : > { %p5322_p1 = scmp.ne.s32.totalorder %s5680_s30, %s5321_s6  ;;  %s5326_s13 = sshll.u32 %s5459_s19, 4  ;;  %s5327_s13 = int_to_ptr.vmem [resolvable:$false] %s5326_s13 }
  0x76   : > { %s5328_s9 = scalar_lea.vmem %s5327_s13, 1024  ;;  %p5329_p2 = scmp.lt.s32.totalorder %s5680_s30, %s5327_s13 }
  0x77   : > { %p5324_p5 = pnand %p5322_p1, %p5310_p8  ;;  %p5330_p6 = scmp.lt.s32.totalorder %s5328_s9, %s5321_s6 }
  0x79   : > { %p5325_p9 = pneg %p5324_p5  ;;  %p5331_p12 = por %p5330_p6, %p5329_p2 }
  0x7b   : > { %p5332_p11 = pnand %p5331_p12, %p5325_p9 }
  0x7d   : > { %5335 = shalt.err (!%p5332_p11)
}
  0x7e   : > { %s6424_s11 = smov 8   ;;  %s6425_s17 = smov 128  }
  0x7f   : > { %s6426_s22 = scalar_lea.sflag [#allocation3], %s5663_s24  ;;  %s4442_s18 = sshll.u32 %s5663_s24, 4 }
  0x80   : > { %5021 = dma.hbm_to_vmem [thread:$0]  (!%p5676_p7), %s5674_s29, 512, %s5680_s30, %s6426_s22, %s6425_s17, %s6425_s17, %s6424_s11  }
  0x81   : > { %s4520_s19 = sshll.u32 %s5444_s28, 8  ;;  %s470_s0 = scalar_lea.vmem [#allocation5], %s4442_s18 }
  0x82   : > { %s5718_s13 = scalar_lea.hbm %s6375_s1, %s4520_s19  ;;  %s477_s2 = sshll.u32 %s470_s0, 4  ;;  %s5720_s2 = int_to_ptr.vmem [resolvable:$true] %s477_s2 }
  0x83   : > { %s6427_s27 = sand.u32 1, %s5444_s28   ;;  %s5336_s16 = scalar_lea.hbm %s5718_s13, 256 }
  0x84   : > { %s467_s21 = scalar_lea.sflag [#allocation6], %s6427_s27  ;;  %p5337_p1 = scmp.ne.s32.totalorder %s5718_s13, %s5336_s16 }
  0x85   : > { %s5341_s24 = scalar_lea.hbm %s6375_s1, 512  ;;  %p5342_p6 = scmp.lt.s32.totalorder %s5718_s13, %s6375_s1 }
  0x86   : > { %p5339_p4 = pnand %p5337_p1, %p5310_p8  ;;  %p5343_p2 = scmp.lt.s32.totalorder %s5341_s24, %s5336_s16 }
  0x88   : > { %p5340_p12 = pneg %p5339_p4  ;;  %p5344_p10 = por %p5343_p2, %p5342_p6 }
  0x8a   : > { %p5345_p13 = pnand %p5344_p10, %p5340_p12 }
  0x8c   : > { %5348 = shalt.err (!%p5345_p13)
}
  0x8d   : > { %s5349_s0 = scalar_lea.vmem %s5720_s2, 256  ;;  %s5460_s27 = smov [#allocation5]  }
  0x8e   : > { %p5350_p0 = scmp.ne.s32.totalorder %s5720_s2, %s5349_s0  ;;  %s5354_s18 = sshll.u32 %s5460_s27, 4  ;;  %s5355_s18 = int_to_ptr.vmem [resolvable:$false] %s5354_s18 }
  0x8f   : > { %s5356_s6 = scalar_lea.vmem %s5355_s18, 512  ;;  %p5357_p11 = scmp.lt.s32.totalorder %s5720_s2, %s5355_s18 }
  0x90   : > { %p5352_p5 = pnand %p5350_p0, %p5310_p8  ;;  %p5358_p1 = scmp.lt.s32.totalorder %s5356_s6, %s5349_s0 }
  0x92   : > { %p5353_p9 = pneg %p5352_p5  ;;  %p5359_p4 = por %p5358_p1, %p5357_p11 }
  0x94   : > { %p5360_p6 = pnand %p5359_p4, %p5353_p9 }
  0x96   : > { %5363 = shalt.err (!%p5360_p6)
}
  0x97   : > { %5024 = dma.hbm_to_vmem [thread:$0]  (!%p5676_p7), %s5718_s13, 256, %s5720_s2, %s467_s21, %s6425_s17, %s6425_s17, %s6424_s11  }
  0x98   : > { %489 = sbr.rel (%p5565_p3) target bundleno = 3071 (0xbff), region = 72  ;;  %s5752_s16 = sand.u32 (!%p5565_p3), 1, %s5436_s26  }
  0x99   : > { %s4446_s9 = sshll.u32 (!%p5565_p3), %s5752_s16, 5  ;;  %s492_s29 = scalar_lea.sflag (!%p5565_p3), [#allocation3], %s5752_s16 }
  0x9a   : > { %s5756_s30 = scalar_lea.vmem (!%p5565_p3), [#allocation2], %s4446_s9  ;;  %p6428_p8 = scmp.ne.s32.totalorder (!%p5565_p3), %s6418_s20, 0 }
  0x9d   : > { %5407 = dma.done.wait (%p6428_p8), %s492_s29, 512  }
  0x9e   : > { %5409 = vsyncadd (%p6428_p8), %s492_s29, 4294966784  ;;  %s500_s4 = sand.u32 1, %s5560_s14   ;;  %s4447_s15 = sshll.u32 %s5752_s16, 4 }
  0x9f   : > { %s501_s21 = scalar_lea.sflag [#allocation6], %s500_s4  ;;  %s5766_s2 = scalar_lea.vmem [#allocation5], %s4447_s15 }
  0xa0   : > { %5411 = dma.done.wait (%p6428_p8), %s501_s21, 256  }
  0xa1   : > { %5413 = vsyncadd (%p6428_p8), %s501_s21, 4294967040  ;;  %p6429_p3 = scmp.eq.s32.totalorder %s5560_s14, 0 }
  0xa3   : > { %5415 = dma.done.wait (%p6429_p3), [#allocation6], 6144   ;;  %p6430_p7 = pmov %p6429_p3 }
  0xa4   : > { %p6431_p12 = pmov %p6429_p3 }
  0xa5   : > { %5417 = vsyncadd (%p6430_p7), [#allocation6], 4294961152 }
  0xa6   : > { %5419 = dma.done.wait (%p6431_p12), [#allocation9], 6144   ;;  %p6432_p2 = pmov %p6429_p3 }
  0xa8   : > { %5421 = vsyncadd (%p6432_p2), [#allocation9], 4294961152  ;;  %p6433_p10 = pmov %p6432_p2 }
  0xa9   : > { %p6434_p13 = pmov %p6432_p2 }
  0xaa   : > { %5423 = dma.done.wait (%p6433_p10), [#allocation12], 16384  }
  0xab   : > { %5425 = vsyncadd (%p6434_p13), [#allocation12], 4294950912  ;;  %v5461_v0 = vmov 0.0   ;;  %v627_v1 = vld [vmem:[#allocation7 + $0x170] sm:$0xff]  ;;  %v626_v2 = vld [vmem:[#allocation7 + $0x168] sm:$0xff]  ;;  %vm5462_vm0 = vmmov 0  }
  0xac   : > { %710 = vmatprep.mubr.f32.mxu0 %v5461_v0  ;;  %v624_v3 = vld [vmem:[#allocation7 + $0x158] sm:$0xff]  ;;  %646 = vmatprep.subr.mxu0 %v627_v1  ;;  %v623_v4 = vld [vmem:[#allocation7 + $0x150] sm:$0xff]  ;;  %v621_v5 = vld [vmem:[#allocation7 + $0x140] sm:$0xff]  ;;  %vm933_vm1 = vcmask 261120   ;;  %vm1238_vm2 = vcmask 130048   ;;  %vm1245_vm3 = vcmask 64512  }
  0xad   : > { %647 = vmatpush1.msra.mxu0 %v626_v2  ;;  %v620_v6 = vld [vmem:[#allocation7 + $0x138] sm:$0xff]  ;;  %v618_v7 = vld [vmem:[#allocation7 + $0x128] sm:$0xff]  ;;  %v617_v8 = vld [vmem:[#allocation7 + $0x120] sm:$0xff]  ;;  %s5463_s24 = smov 96   ;;  %s5464_s22 = smov 64   ;;  %vm3606_vm4 = vcmask 523264  }
  0xae   : > { %648 = vmatprep.subr.mxu0 %v624_v3  ;;  %v615_v9 = vld [vmem:[#allocation7 + $0x110] sm:$0xff]  ;;  %v614_v10 = vld [vmem:[#allocation7 + $0x108] sm:$0xff]  ;;  %v612_v11 = vld [vmem:[#allocation7 + $0xf8] sm:$0xff]  ;;  %s5465_s19 = smov 32   ;;  %vm3609_vm5 = vcmask 785408   ;;  %s571_s21 = scalar_lea.vmem [#allocation14], %s4447_s15 }
  0xaf   : > { %649 = vmatpush1.msra.mxu0 %v623_v4  ;;  %v611_v12 = vld [vmem:[#allocation7 + $0xf0] sm:$0xff]  ;;  %v609_v13 = vld [vmem:[#allocation7 + $0xe0] sm:$0xff]  ;;  %v608_v15 = vld [vmem:[#allocation7 + $0xd8] sm:$0xff]  ;;  %s4521_s20 = sshll.u32 %s5560_s14, 8  ;;  %s6435_s13 = sld [smem:[#allocation31_spill]] }
  0xb0   : > { %650 = vmatprep.subr.mxu0 %v621_v5  ;;  %v579_v14 = vld [vmem:[%s5766_s2] sm:$0xff]  ;;  %v606_v16 = vld [vmem:[#allocation7 + $0xc8] sm:$0xff]  ;;  %v600_v20 = vld [vmem:[#allocation7 + $0x98] sm:$0xff]  ;;  %s4274_s15 = scalar_lea.sflag [#allocation4], %s5752_s16  ;;  %p6436_p5 = scmp.ne.s32.totalorder %s6419_s23, 0 }
  0xb1   : > { %651 = vmatpush1.msra.mxu0 %v620_v6  ;;  %4746 = vmatprep.mubr.f32.mxu1 %v579_v14  ;;  %v605_v17 = vld [vmem:[#allocation7 + $0xc0] sm:$0xff]  ;;  %v603_v18 = vld [vmem:[#allocation7 + $0xb0] sm:$0xff]  ;;  %v602_v19 = vld [vmem:[#allocation7 + $0xa8] sm:$0xff]  ;;  %s5466_s14 = smov [#allocation14]  }
  0xb2   : > { %652 = vmatprep.subr.mxu0 %v618_v7  ;;  %v599_v21 = vld [vmem:[#allocation7 + $0x90] sm:$0xff]  ;;  %v597_v22 = vld [vmem:[#allocation7 + $0x80] sm:$0xff]  ;;  %v596_v23 = vld [vmem:[#allocation7 + $0x78] sm:$0xff] }
  0xb3   : > { %653 = vmatpush1.msra.mxu0 %v617_v8  ;;  %v594_v24 = vld [vmem:[#allocation7 + $0x68] sm:$0xff]  ;;  %v593_v25 = vld [vmem:[#allocation7 + $0x60] sm:$0xff]  ;;  %v591_v26 = vld [vmem:[#allocation7 + $0x50] sm:$0xff] }
  0xb4   : > { %654 = vmatprep.subr.mxu0 %v615_v9  ;;  %v590_v27 = vld [vmem:[#allocation7 + $0x48] sm:$0xff]  ;;  %v588_v28 = vld [vmem:[#allocation7 + $0x38] sm:$0xff]  ;;  %v587_v29 = vld [vmem:[#allocation7 + $0x30] sm:$0xff] }
  0xb5   : > { %655 = vmatpush1.msra.mxu0 %v614_v10  ;;  %v585_v30 = vld [vmem:[#allocation7 + $0x20] sm:$0xff]  ;;  %v584_v31 = vld [vmem:[#allocation7 + $0x18] sm:$0xff]  ;;  %v582_v32 = vld [vmem:[#allocation7 + $0x8] sm:$0xff] }
  0xb6   : > { %656 = vmatprep.subr.mxu0 %v612_v11  ;;  %v581_v33 = vld [vmem:[#allocation7] sm:$0xff]  ;;  %v829_v34 = vld [vmem:[#allocation8 + $0xf8] sm:$0xff]  ;;  %v828_v35 = vld [vmem:[#allocation8 + $0xf0] sm:$0xff] }
  0xb7   : > { %657 = vmatpush1.msra.mxu0 %v611_v12  ;;  %v827_v36 = vld [vmem:[#allocation8 + $0xe8] sm:$0xff]  ;;  %v826_v37 = vld [vmem:[#allocation8 + $0xe0] sm:$0xff]  ;;  %v825_v38 = vld [vmem:[#allocation8 + $0xd8] sm:$0xff] }
  0xb8   : > { %658 = vmatprep.subr.mxu0 %v609_v13  ;;  %v5788_v39 = vld [vmem:[%s5766_s2 + $0x8] sm:$0xff]  ;;  %v824_v40 = vld [vmem:[#allocation8 + $0xd0] sm:$0xff]  ;;  %v822_v42 = vld [vmem:[#allocation8 + $0xc0] sm:$0xff] }
  0xb9   : > { %659 = vmatpush1.msra.mxu0 %v608_v15  ;;  %v823_v41 = vld [vmem:[#allocation8 + $0xc8] sm:$0xff]  ;;  %v821_v43 = vld [vmem:[#allocation8 + $0xb8] sm:$0xff]  ;;  %v820_v44 = vld [vmem:[#allocation8 + $0xb0] sm:$0xff] }
  0xba   : > { %660 = vmatprep.subr.mxu0 %v606_v16  ;;  %v819_v45 = vld [vmem:[#allocation8 + $0xa8] sm:$0xff]  ;;  %v818_v46 = vld [vmem:[#allocation8 + $0xa0] sm:$0xff]  ;;  %v817_v47 = vld [vmem:[#allocation8 + $0x98] sm:$0xff] }
  0xbb   : > { %661 = vmatpush1.msra.mxu0 %v605_v17  ;;  %v816_v48 = vld [vmem:[#allocation8 + $0x90] sm:$0xff]  ;;  %v815_v49 = vld [vmem:[#allocation8 + $0x88] sm:$0xff]  ;;  %v814_v50 = vld [vmem:[#allocation8 + $0x80] sm:$0xff] }
  0xbc   : > { %662 = vmatprep.subr.mxu0 %v603_v18  ;;  %v813_v51 = vld [vmem:[#allocation8 + $0x78] sm:$0xff]  ;;  %v812_v52 = vld [vmem:[#allocation8 + $0x70] sm:$0xff]  ;;  %v811_v53 = vld [vmem:[#allocation8 + $0x68] sm:$0xff] }
  0xbd   : > { %663 = vmatpush1.msra.mxu0 %v602_v19  ;;  %v810_v54 = vld [vmem:[#allocation8 + $0x60] sm:$0xff]  ;;  %v809_v55 = vld [vmem:[#allocation8 + $0x58] sm:$0xff]  ;;  %v808_v56 = vld [vmem:[#allocation8 + $0x50] sm:$0xff] }
  0xbe   : > { %664 = vmatprep.subr.mxu0 %v600_v20  ;;  %v807_v57 = vld [vmem:[#allocation8 + $0x48] sm:$0xff]  ;;  %v806_v58 = vld [vmem:[#allocation8 + $0x40] sm:$0xff]  ;;  %v805_v59 = vld [vmem:[#allocation8 + $0x38] sm:$0xff] }
  0xbf   : > { %665 = vmatpush1.msra.mxu0 %v599_v21  ;;  %v804_v60 = vld [vmem:[#allocation8 + $0x30] sm:$0xff]  ;;  %v803_v61 = vld [vmem:[#allocation8 + $0x28] sm:$0xff]  ;;  %v802_v62 = vld [vmem:[#allocation8 + $0x20] sm:$0xff] }
  0xc0   : > { %666 = vmatprep.subr.mxu0 %v597_v22  ;;  %v801_v63 = vld [vmem:[#allocation8 + $0x18] sm:$0xff]  ;;  %v800_v1 = vld [vmem:[#allocation8 + $0x10] sm:$0xff]  ;;  %v799_v2 = vld [vmem:[#allocation8 + $0x8] sm:$0xff] }
  0xc1   : > { %667 = vmatpush1.msra.mxu0 %v596_v23  ;;  %v798_v3 = vld [vmem:[#allocation8] sm:$0xff]  ;;  %v576_v5 = vld [vmem:[%s5756_s30 + $0x8] sm:$0xff]  ;;  %v577_v6 = vld [vmem:[%s5756_s30 + $0x10] sm:$0xff] }
  0xc2   : > { %668 = vmatprep.subr.mxu0 %v594_v24  ;;  %v575_v4 = vld [vmem:[%s5756_s30] sm:$0xff]  ;;  %v578_v7 = vld [vmem:[%s5756_s30 + $0x18] sm:$0xff]  ;;  %v622_v10 = vld [vmem:[#allocation7 + $0x148] sm:$0xff] }
  0xc3   : > { %669 = vmatpush1.msra.mxu0 %v593_v25  ;;  %v628_v8 = vld [vmem:[#allocation7 + $0x178] sm:$0xff]  ;;  %v625_v9 = vld [vmem:[#allocation7 + $0x160] sm:$0xff]  ;;  %v619_v11 = vld [vmem:[#allocation7 + $0x130] sm:$0xff]  ;;  %v631_v25 = vlaneseq }
  0xc4   : > { %670 = vmatprep.subr.mxu0 %v591_v26  ;;  %4714 = vmatprep.subr.mxu1 %v628_v8  ;;  %v616_v12 = vld [vmem:[#allocation7 + $0x118] sm:$0xff]  ;;  %v613_v13 = vld [vmem:[#allocation7 + $0x100] sm:$0xff]  ;;  %v607_v15 = vld [vmem:[#allocation7 + $0xd0] sm:$0xff] }
  0xc5   : > { %671 = vmatpush1.msra.mxu0 %v590_v27  ;;  %4715 = vmatpush3.msra.mxu1 %v628_v8  ;;  %v604_v16 = vld [vmem:[#allocation7 + $0xb8] sm:$0xff]  ;;  %v601_v17 = vld [vmem:[#allocation7 + $0xa0] sm:$0xff]  ;;  %v598_v18 = vld [vmem:[#allocation7 + $0x88] sm:$0xff]  ;;  %v5806_v27 = vshrl.u32 %v631_v25, 7 }
  0xc6   : > { %672 = vmatprep.subr.mxu0 %v588_v28  ;;  %4716 = vmatprep.subr.mxu1 %v625_v9  ;;  %v595_v19 = vld [vmem:[#allocation7 + $0x70] sm:$0xff]  ;;  %v592_v20 = vld [vmem:[#allocation7 + $0x58] sm:$0xff]  ;;  %v589_v21 = vld [vmem:[#allocation7 + $0x40] sm:$0xff] }
  0xc7   : > { %673 = vmatpush1.msra.mxu0 %v587_v29  ;;  %4717 = vmatpush3.msra.mxu1 %v625_v9  ;;  %v586_v22 = vld [vmem:[#allocation7 + $0x28] sm:$0xff]  ;;  %v583_v23 = vld [vmem:[#allocation7 + $0x10] sm:$0xff]  ;;  %v5809_v29 = vsub.s32 1, %v5806_v27 }
  0xc8   : > { %674 = vmatprep.subr.mxu0 %v585_v30  ;;  %4718 = vmatprep.subr.mxu1 %v622_v10 }
  0xc9   : > { %675 = vmatpush1.msra.mxu0 %v584_v31  ;;  %4719 = vmatpush3.msra.mxu1 %v622_v10  ;;  %v830_v31 = vld [vmem:[%s6379_s5] sm:$0x3] }
  0xca   : > { %676 = vmatprep.subr.mxu0 %v582_v32  ;;  %4720 = vmatprep.subr.mxu1 %v619_v11  ;;  %v5815_v32 = vrot.slane %v830_v31, %v5809_v29 }
  0xcb   : > { %677 = vmatpush1.msra.mxu0 %v581_v33  ;;  %4721 = vmatpush3.msra.mxu1 %v619_v11  ;;  %v5818_v33 = vsub.s32 0, %v5806_v27 }
  0xcc   : > { %711 = vmatmul.mubr.f32.vlgmr.msra.gmra.mxu0 %v579_v14  ;;  %842 = vmatprep.subr.mxu0 %v829_v34  ;;  %v610_v14 = vld [vmem:[#allocation7 + $0xe8] sm:$0xff] }
  0xcd   : > { %843 = vmatpush1.msra.mxu0 %v828_v35  ;;  %716 = vmatprep.mubr.f32.mxu0 %v5461_v0  ;;  %v629_v35 = vld [vmem:[%s6377_s3] sm:$0x7] }
  0xce   : > { %844 = vmatprep.subr.mxu0 %v827_v36  ;;  %4722 = vmatprep.subr.mxu1 %v616_v12 }
  0xcf   : > { %845 = vmatpush1.msra.mxu0 %v826_v37  ;;  %4723 = vmatpush3.msra.mxu1 %v616_v12  ;;  %v835_v37 = vrot.slane %v830_v31, %v5818_v33 }
  0xd0   : > { %846 = vmatprep.subr.mxu0 %v825_v38  ;;  %717 = vmatmul.mubr.f32.gmra.mxu0 %v5788_v39 }
  0xd1   : > { %847 = vmatpush1.msra.mxu0 %v824_v40  ;;  %906 = vmatprep.mubr.f32.mxu0 %v5461_v0 }
  0xd2   : > { %848 = vmatprep.subr.mxu0 %v823_v41  ;;  %4724 = vmatprep.subr.mxu1 %v613_v13 }
  0xd3   : > { %849 = vmatpush1.msra.mxu0 %v822_v42  ;;  %4725 = vmatpush3.msra.mxu1 %v613_v13 }
  0xd4   : > { %850 = vmatprep.subr.mxu0 %v821_v43  ;;  %4726 = vmatprep.subr.mxu1 %v610_v14 }
  0xd5   : > { %851 = vmatpush1.msra.mxu0 %v820_v44  ;;  %4727 = vmatpush3.msra.mxu1 %v610_v14 }
  0xd6   : > { %852 = vmatprep.subr.mxu0 %v819_v45  ;;  %4728 = vmatprep.subr.mxu1 %v607_v15 }
  0xd7   : > { %853 = vmatpush1.msra.mxu0 %v818_v46  ;;  %4729 = vmatpush3.msra.mxu1 %v607_v15 }
  0xd8   : > { %854 = vmatprep.subr.mxu0 %v817_v47  ;;  %4730 = vmatprep.subr.mxu1 %v604_v16 }
  0xd9   : > { %855 = vmatpush1.msra.mxu0 %v816_v48  ;;  %4731 = vmatpush3.msra.mxu1 %v604_v16 }
  0xda   : > { %856 = vmatprep.subr.mxu0 %v815_v49  ;;  %4732 = vmatprep.subr.mxu1 %v601_v17 }
  0xdb   : > { %857 = vmatpush1.msra.mxu0 %v814_v50  ;;  %4733 = vmatpush3.msra.mxu1 %v601_v17 }
  0xdc   : > { %858 = vmatprep.subr.mxu0 %v813_v51  ;;  %4734 = vmatprep.subr.mxu1 %v598_v18 }
  0xdd   : > { %859 = vmatpush1.msra.mxu0 %v812_v52  ;;  %4735 = vmatpush3.msra.mxu1 %v598_v18 }
  0xde   : > { %860 = vmatprep.subr.mxu0 %v811_v53  ;;  %4736 = vmatprep.subr.mxu1 %v595_v19  ;;  %v638_v53 = vrot.slane %v629_v35, %v5809_v29 }
  0xdf   : > { %861 = vmatpush1.msra.mxu0 %v810_v54  ;;  %4737 = vmatpush3.msra.mxu1 %v595_v19 }
  0xe0   : > { %862 = vmatprep.subr.mxu0 %v809_v55  ;;  %4738 = vmatprep.subr.mxu1 %v592_v20 }
  0xe1   : > { %863 = vmatpush1.msra.mxu0 %v808_v56  ;;  %4739 = vmatpush3.msra.mxu1 %v592_v20 }
  0xe2   : > { %864 = vmatprep.subr.mxu0 %v807_v57  ;;  %4740 = vmatprep.subr.mxu1 %v589_v21 }
  0xe3   : > { %865 = vmatpush1.msra.mxu0 %v806_v58  ;;  %4741 = vmatpush3.msra.mxu1 %v589_v21  ;;  %v641_v58 = vsub.s32 2, %v5806_v27 }
  0xe4   : > { %866 = vmatprep.subr.mxu0 %v805_v59  ;;  %4742 = vmatprep.subr.mxu1 %v586_v22 }
  0xe5   : > { %867 = vmatpush1.msra.mxu0 %v804_v60  ;;  %4743 = vmatpush3.msra.mxu1 %v586_v22  ;;  %v642_v59 = vrot.slane %v629_v35, %v641_v58 }
  0xe6   : > { %868 = vmatprep.subr.mxu0 %v803_v61  ;;  %4744 = vmatprep.subr.mxu1 %v583_v23 }
  0xe7   : > { %869 = vmatpush1.msra.mxu0 %v802_v62  ;;  %4745 = vmatpush3.msra.mxu1 %v583_v23 }
  0xe8   : > { %870 = vmatprep.subr.mxu0 %v801_v63  ;;  %4747 = vmatmul.mubr.f32.vlgmr.msra.gmra.mxu1 %v5788_v39  ;;  %v634_v39 = vrot.slane %v629_v35, %v5818_v33 }
  0xe9   : > { %871 = vmatpush1.msra.mxu0 %v800_v1  ;;  %4749 = vmatprep.subr.mxu1 %v5461_v0 }
  0xea   : > { %872 = vmatprep.subr.mxu0 %v799_v2  ;;  %4753 = vmatprep.mubr.msk.f32.mxu1 %vm5462_vm0, %v5461_v0 }
  0xeb   : > { %873 = vmatpush1.msra.mxu0 %v798_v3 }
  0xec   : > { %907 = vmatmul.mubr.f32.vlgmr.msra.gmra.mxu0 %v575_v4  ;;  %4797 = vmatprep.subr.mxu0 %v5461_v0 }
  0xed   : > { %912 = vmatprep.mubr.f32.mxu0 %v5461_v0 }
  0xf0   : > { %913 = vmatmul.mubr.f32.gmra.mxu0 %v576_v5 }
  0xf1   : > { %918 = vmatprep.mubr.f32.mxu0 %v5461_v0 }
  0xf4   : > { %919 = vmatmul.mubr.f32.gmra.mxu0 %v577_v6 }
  0xf5   : > { %924 = vmatprep.mubr.f32.mxu0 %v5461_v0 }
  0xf8   : > { %925 = vmatmul.mubr.f32.gmra.mxu0 %v578_v7 }
  0xf9   : > { %4801 = vmatprep.mubr.msk.f32.mxu0 %vm5462_vm0, %v5461_v0 }
 0x18c   : > { %v712_v24 = vpop.f32.mrf.mxu0 }
 0x18d   : > { %v713_v44 = vadd.f32 %v712_v24, %v634_v39 }
 0x18e   : > { %v714_v26 = vpop.f32.mrf.mxu0 }
 0x18f   : > { %v5843_v49 = vmul.f32 0.03125, %v713_v44  ;;  %v5863_v56 = vadd.f32 %v714_v26, %v638_v53 }
 0x190   : > { %v718_v28 = vpop.f32.mrf.mxu0 }
 0x191   : > { %v719_v52 = vadd.f32 %v718_v28, %v634_v39 }
 0x192   : > { %v720_v30 = vpop.f32.mrf.mxu0 }
 0x193   : > { %v5860_v55 = vmul.f32 0.03125, %v719_v52  ;;  %v5872_v57 = vadd.f32 %v720_v30, %v638_v53 }
 0x1a8   : > { %v4748_v60 = vpop.f32.mrf.mxu1 }
 0x1a9   : > { %v5888_v61 = vadd.f32 %v4748_v60, %v642_v59 }
 0x1aa   : > { %v789_v62 = vpop.f32.mrf.mxu1 }
 0x1ab   : > { %v5890_v63 = vadd.f32 %v789_v62, %v642_v59 }
 0x1ac   : > { %v908_v34 = vpop.f32.mrf.mxu0 }
 0x1ad   : > { %v5836_v46 = vadd.f32 %v908_v34, %v835_v37 }
 0x1ae   : > { %v910_v36 = vpop.f32.mrf.mxu0 }
 0x1af   : > { %v5825_v38 = vadd.f32 %v910_v36, %v5815_v32 }
 0x1b0   : > { %v914_v40 = vpop.f32.mrf.mxu0 }
 0x1b1   : > { %v5828_v41 = vadd.f32 %v914_v40, %v835_v37 }
 0x1b2   : > { %v916_v42 = vpop.f32.mrf.mxu0 }
 0x1b3   : > { %v5831_v43 = vadd.f32 %v916_v42, %v5815_v32  ;;  %4750 = vmatpush3.xpose.msk.msra.mxu1 %vm933_vm1, %v5828_v41 }
 0x1b4   : > { %v920_v45 = vpop.f32.mrf.mxu0  ;;  %4751 = vmatprep.subr.mxu1 %v5461_v0 }
 0x1b5   : > { %v5856_v54 = vadd.f32 %v920_v45, %v835_v37 }
 0x1b6   : > { %v922_v47 = vpop.f32.mrf.mxu0 }
 0x1b7   : > { %v5839_v48 = vadd.f32 %v922_v47, %v5815_v32  ;;  %4752 = vmatpush3.xpose.msk.msra.mxu1 %vm933_vm1, %v5836_v46 }
 0x1b8   : > { %v926_v50 = vpop.f32.mrf.mxu0  ;;  %4756 = vmatprep.subr.mxu1 %v5461_v0 }
 0x1b9   : > { %v5846_v51 = vadd.f32 %v926_v50, %v835_v37 }
 0x1ba   : > { %4754 = vmatmul.mubr.msk.f32.vlgmr.msra.gmra.mxu1 %vm933_vm1, %v5843_v49  ;;  %v928_v13 = vpop.f32.mrf.mxu0 }
 0x1bb   : > { %4757 = vmatpush3.xpose.msk.msra.mxu1 %vm933_vm1, %v5846_v51  ;;  %4760 = vmatprep.mubr.msk.f32.mxu1 %vm5462_vm0, %v5461_v0  ;;  %v5915_v14 = vadd.f32 %v928_v13, %v5815_v32 }
 0x1bc   : > { %4758 = vmatprep.subr.mxu1 %v5461_v0 }
 0x1bf   : > { %4759 = vmatpush3.xpose.msk.msra.mxu1 %vm933_vm1, %v5856_v54 }
 0x1c0   : > { %4763 = vmatprep.subr.mxu1 %v5461_v0 }
 0x1c2   : > { %4761 = vmatmul.mubr.msk.f32.vlgmr.msra.gmra.mxu1 %vm933_vm1, %v5860_v55 }
 0x1c3   : > { %4764 = vmatpush3.xpose.msk.msra.mxu1 %vm933_vm1, %v5863_v56  ;;  %4765 = vmatprep.mubr.msk.f32.mxu1 %vm5462_vm0, %v5461_v0 }
 0x1c4   : > { %4768 = vmatprep.subr.mxu1 %v5461_v0 }
 0x1c6   : > { %4766 = vmatmul.mubr.msk.f32.vlgmr.msra.gmra.mxu1 %vm933_vm1, %v5843_v49 }
 0x1c7   : > { %4769 = vmatpush3.xpose.msk.msra.mxu1 %vm933_vm1, %v5872_v57  ;;  %4770 = vmatprep.mubr.msk.f32.mxu1 %vm5462_vm0, %v5461_v0 }
 0x1c8   : > { %4773 = vmatprep.subr.mxu1 %v5461_v0 }
 0x1ca   : > { %4771 = vmatmul.mubr.msk.f32.vlgmr.msra.gmra.mxu1 %vm933_vm1, %v5860_v55 }
 0x1cb   : > { %4775 = vmatprep.mubr.msk.f32.mxu1 %vm5462_vm0, %v5461_v0  ;;  %4774 = vmatpush3.msra.mxu1 %v5890_v63 }
 0x1cc   : > { %4778 = vmatprep.subr.mxu1 %v5461_v0 }
 0x27a   : > { %v1009_v1 = vpop.f32.mrf.mxu1 }
 0x27b   : > { %v1239_v2 = vsel %vm1238_vm2, %v1009_v1, -inf }
 0x27c   : > { %1240 = vmax.xlane.f32.xlu0 %v1239_v2  ;;  %v4755_v3 = vpop.f32.mrf.mxu1 }
 0x282   : > { %v1088_v4 = vpop.f32.mrf.mxu1 }
 0x283   : > { %v1242_v5 = vsel %vm1238_vm2, %v1088_v4, -inf }
 0x284   : > { %1243 = vmax.xlane.f32.xlu1 %v1242_v5  ;;  %v4762_v6 = vpop.f32.mrf.mxu1 }
 0x286   : > { %v1161_v7 = vpop.f32.mrf.mxu1 }
 0x287   : > { %v1246_v8 = vsel %vm1245_vm3, %v1161_v7, -inf }
 0x288   : > { %1247 = vmax.xlane.f32.xlu0 %v1246_v8  ;;  %v4767_v9 = vpop.f32.mrf.mxu1 }
 0x28a   : > { %v1234_v10 = vpop.f32.mrf.mxu1 }
 0x28b   : > { %v1249_v11 = vsel %vm1245_vm3, %v1234_v10, -inf }
 0x28c   : > { %1250 = vmax.xlane.f32.xlu1 %v1249_v11  ;;  %v4772_v12 = vpop.f32.mrf.mxu1 }
 0x29d   : > { %1660 = vrot.lane.b32.xlu1 %v5856_v54, %s5463_s24 }
 0x29e   : > { %1662 = vrot.lane.b32.xlu0 %v5846_v51, %s5463_s24 }
 0x2a1   : > { %1658 = vrot.lane.b32.xlu1 %v5860_v55, %s5463_s24 }
 0x2a2   : > { %1580 = vrot.lane.b32.xlu0 %v5828_v41, %s5463_s24 }
 0x2a5   : > { %1814 = vrot.lane.b32.xlu1 %v5872_v57, %s5463_s24 }
 0x2a6   : > { %1576 = vrot.lane.b32.xlu0 %v5843_v49, %s5463_s24 }
 0x2a9   : > { %1578 = vrot.lane.b32.xlu1 %v5836_v46, %s5463_s24 }
 0x2ad   : > { %1740 = vrot.lane.b32.xlu1 %v5863_v56, %s5463_s24 }
 0x2b1   : > { %2167 = vrot.lane.b32.xlu1 %v5915_v14, %s5463_s24 }
 0x2b5   : > { %2165 = vrot.lane.b32.xlu1 %v5839_v48, %s5463_s24 }
 0x305   : > { %v1241_v15 = vpop.xlane.xlu0 %1240 }
 0x30d   : > { %v1244_v16 = vpop.xlane.xlu1 %1243 }
 0x311   : > { %v1248_v17 = vpop.xlane.xlu0 %1247 }
 0x312   : > { %v1252_v18 = vmax.f32 %v1241_v15, %v1248_v17 }
 0x314   : > { %v1260_v19 = vsub.f32 %v1161_v7, %v1252_v18  ;;  %v1254_v25 = vsub.f32 %v1009_v1, %v1252_v18 }
 0x315   : > { %v1663_v20 = vpop.permute.xlu0 %1662  ;;  %v1251_v21 = vpop.xlane.xlu1 %1250 }
 0x316   : > { %v1262_v22 = vmul.f32 1.442695, %v1260_v19  ;;  %v1253_v23 = vmax.f32 %v1244_v16, %v1251_v21  ;;  %v1256_v31 = vmul.f32 1.442695, %v1254_v25 }
 0x318   : > { %v1261_v24 = vsub.f32 %v1234_v10, %v1253_v23  ;;  %5108 = vpow2.f32 %v1262_v22  ;;  %v1255_v32 = vsub.f32 %v1088_v4, %v1253_v23 }
 0x319   : > { %v1581_v26 = vpop.permute.xlu0 %1580  ;;  %v1661_v28 = vpop.permute.xlu1 %1660 }
 0x31a   : > { %v1264_v30 = vmul.f32 1.442695, %v1261_v24  ;;  %4798 = vmatpush3.xpose.msk.msra.mxu0 %vm933_vm1, %v1581_v26  ;;  %v1258_v35 = vmul.f32 1.442695, %v1255_v32 }
 0x31b   : > { %4799 = vmatprep.subr.mxu0 %v5461_v0 }
 0x31c   : > { %5110 = vpow2.f32 %v1264_v30 }
 0x31d   : > { %v1659_v34 = vpop.permute.xlu1 %1658  ;;  %5112 = vpow2.f32 %v1256_v31  ;;  %v1577_v40 = vpop.permute.xlu0 %1576 }
 0x31e   : > { %5114 = vpow2.f32 %v1258_v35 }
 0x321   : > { %v1815_v36 = vpop.permute.xlu1 %1814 }
 0x325   : > { %v1579_v37 = vpop.permute.xlu1 %1578  ;;  %v5923_v39 = vpop.eup %5108 }
 0x326   : > { %4800 = vmatpush3.xpose.msk.msra.mxu0 %vm933_vm1, %v1579_v37  ;;  %4776 = vmatmul.mubr.msk.f32.vlgmr.msra.gmra.mxu1 %vm1245_vm3, %v5923_v39 }
 0x327   : > { %4811 = vmatprep.subr.mxu0 %v5461_v0  ;;  %4779 = vmatpush3.msra.mxu1 %v5888_v61 }
 0x328   : > { %4780 = vmatprep.mubr.msk.f32.mxu1 %vm5462_vm0, %v5461_v0  ;;  %4783 = vmatprep.subr.mxu1 %v5461_v0 }
 0x329   : > { %4802 = vmatmul.mubr.msk.f32.vlgmr.msra.gmra.mxu0 %vm933_vm1, %v1577_v40  ;;  %v1741_v42 = vpop.permute.xlu1 %1740  ;;  %v5934_v44 = vpop.eup %5110 }
 0x32a   : > { %4812 = vmatpush3.xpose.msk.msra.mxu0 %vm933_vm1, %v1741_v42  ;;  %4813 = vmatprep.mubr.msk.f32.mxu0 %vm5462_vm0, %v5461_v0  ;;  %v5947_v45 = vpop.eup %5112 }
 0x32b   : > { %4781 = vmatmul.mubr.msk.f32.vlgmr.msra.gmra.mxu1 %vm1245_vm3, %v5934_v44  ;;  %4821 = vmatprep.subr.mxu0 %v5461_v0  ;;  %v5959_v47 = vpop.eup %5114 }
 0x32c   : > { %4784 = vmatpush3.msra.mxu1 %v5831_v43  ;;  %4787 = vmatprep.mubr.msk.f32.mxu1 %vm5462_vm0, %v5461_v0 }
 0x32d   : > { %4785 = vmatprep.subr.mxu1 %v5461_v0  ;;  %4814 = vmatmul.mubr.msk.f32.vlgmr.msra.gmra.mxu0 %vm933_vm1, %v1577_v40 }
 0x32e   : > { %4786 = vmatpush3.msra.mxu1 %v5825_v38  ;;  %4823 = vmatprep.mubr.msk.f32.mxu0 %vm5462_vm0, %v5461_v0 }
 0x32f   : > { %4790 = vmatprep.subr.mxu1 %v5461_v0  ;;  %4788 = vmatmul.mubr.msk.f32.vlgmr.msra.gmra.mxu1 %vm1238_vm2, %v5947_v45 }
 0x330   : > { %4791 = vmatpush3.msra.mxu1 %v5915_v14  ;;  %4794 = vmatprep.mubr.msk.f32.mxu1 %vm5462_vm0, %v5461_v0 }
 0x331   : > { %4792 = vmatprep.subr.mxu1 %v5461_v0 }
 0x332   : > { %4793 = vmatpush3.msra.mxu1 %v5839_v48 }
 0x333   : > { %4804 = vmatprep.subr.mxu1 %v5461_v0  ;;  %4795 = vmatmul.mubr.msk.f32.vlgmr.msra.gmra.mxu1 %vm1238_vm2, %v5959_v47 }
 0x334   : > { %4805 = vmatpush3.xpose.msk.msra.mxu1 %vm933_vm1, %v1663_v20  ;;  %4808 = vmatprep.mubr.msk.f32.mxu1 %vm5462_vm0, %v5461_v0  ;;  %v2168_v20 = vpop.permute.xlu1 %2167 }
 0x335   : > { %4806 = vmatprep.subr.mxu1 %v5461_v0 }
 0x338   : > { %4807 = vmatpush3.xpose.msk.msra.mxu1 %vm933_vm1, %v1661_v28  ;;  %v2166_v22 = vpop.permute.xlu1 %2165 }
 0x339   : > { %4816 = vmatprep.subr.mxu1 %v5461_v0 }
 0x33b   : > { %4809 = vmatmul.mubr.msk.f32.vlgmr.msra.gmra.mxu1 %vm933_vm1, %v1659_v34 }
 0x33c   : > { %4817 = vmatpush3.xpose.msk.msra.mxu1 %vm933_vm1, %v1815_v36  ;;  %4818 = vmatprep.mubr.msk.f32.mxu1 %vm5462_vm0, %v5461_v0 }
 0x33d   : > { %4826 = vmatprep.subr.mxu1 %v5461_v0 }
 0x33f   : > { %4819 = vmatmul.mubr.msk.f32.vlgmr.msra.gmra.mxu1 %vm933_vm1, %v1659_v34 }
 0x340   : > { %4828 = vmatprep.mubr.msk.f32.mxu1 %vm5462_vm0, %v5461_v0 }
 0x3e6   : > { %v1349_v50 = vpop.f32.mrf.mxu1 }
 0x3e8   : > { %v4777_v52 = vpop.f32.mrf.mxu1 }
 0x3e9   : > { %v1654_v53 = vpop.f32.mrf.mxu0 }
 0x3ea   : > { %v1888_v59 = vsel %vm1238_vm2, %v1654_v53, -inf }
 0x3eb   : > { %v1422_v60 = vpop.f32.mrf.mxu1  ;;  %1889 = vmax.xlane.f32.xlu0 %v1888_v59  ;;  %v4803_v62 = vpop.f32.mrf.mxu0 }
 0x3ed   : > { %v4782_v1 = vpop.f32.mrf.mxu1  ;;  %v1810_v2 = vpop.f32.mrf.mxu0 }
 0x3ee   : > { %v1894_v3 = vsel %vm1245_vm3, %v1810_v2, -inf }
 0x3ef   : > { %v1495_v4 = vpop.f32.mrf.mxu1  ;;  %1895 = vmax.xlane.f32.xlu0 %v1894_v3  ;;  %v4815_v5 = vpop.f32.mrf.mxu0 }
 0x3f0   : > { %v5981_v6 = vadd.f32 %v1495_v4, %v1349_v50 }
 0x3f1   : > { %v4789_v7 = vpop.f32.mrf.mxu1 }
 0x3f3   : > { %v1568_v8 = vpop.f32.mrf.mxu1 }
 0x3f4   : > { %v5983_v9 = vadd.f32 %v1568_v8, %v1422_v60 }
 0x3f5   : > { %v4796_v10 = vpop.f32.mrf.mxu1 }
 0x3fb   : > { %v1736_v11 = vpop.f32.mrf.mxu1 }
 0x3fc   : > { %v1891_v12 = vsel %vm1238_vm2, %v1736_v11, -inf }
 0x3fd   : > { %1892 = vmax.xlane.f32.xlu0 %v1891_v12  ;;  %v4810_v13 = vpop.f32.mrf.mxu1 }
 0x3ff   : > { %v1884_v15 = vpop.f32.mrf.mxu1 }
 0x400   : > { %v1897_v16 = vsel %vm1245_vm3, %v1884_v15, -inf }
 0x401   : > { %1898 = vmax.xlane.f32.xlu1 %v1897_v16  ;;  %v4820_v17 = vpop.f32.mrf.mxu1 }
 0x412   : > { %2252 = vrot.lane.b32.xlu1 %v5828_v41, %s5464_s22 }
 0x413   : > { %2006 = vrot.lane.b32.xlu0 %v5888_v61, %s5463_s24 }
 0x416   : > { %2248 = vrot.lane.b32.xlu1 %v5843_v49, %s5464_s22 }
 0x417   : > { %2250 = vrot.lane.b32.xlu0 %v5836_v46, %s5464_s22 }
 0x41a   : > { %2332 = vrot.lane.b32.xlu1 %v5856_v54, %s5464_s22 }
 0x41b   : > { %2334 = vrot.lane.b32.xlu0 %v5846_v51, %s5464_s22 }
 0x41e   : > { %2486 = vrot.lane.b32.xlu1 %v5872_v57, %s5464_s22 }
 0x41f   : > { %2330 = vrot.lane.b32.xlu0 %v5860_v55, %s5464_s22 }
 0x422   : > { %2086 = vrot.lane.b32.xlu1 %v5831_v43, %s5463_s24 }
 0x423   : > { %1929 = vrot.lane.b32.xlu0 %v5890_v63, %s5463_s24 }
 0x426   : > { %2412 = vrot.lane.b32.xlu1 %v5863_v56, %s5464_s22 }
 0x427   : > { %2084 = vrot.lane.b32.xlu0 %v5825_v38, %s5463_s24 }
 0x42a   : > { %2833 = vrot.lane.b32.xlu1 %v5915_v14, %s5464_s22 }
 0x42e   : > { %2831 = vrot.lane.b32.xlu1 %v5839_v48, %s5464_s22 }
 0x432   : > { %2918 = vrot.lane.b32.xlu1 %v5828_v41, %s5465_s19 }
 0x474   : > { %v1890_v18 = vpop.xlane.xlu0 %1889 }
 0x478   : > { %v1896_v19 = vpop.xlane.xlu0 %1895 }
 0x479   : > { %v1900_v21 = vmax.f32 %v1890_v18, %v1896_v19 }
 0x47b   : > { %v1908_v23 = vsub.f32 %v1810_v2, %v1900_v21  ;;  %v1902_v31 = vsub.f32 %v1654_v53, %v1900_v21 }
 0x47d   : > { %v1910_v25 = vmul.f32 1.442695, %v1908_v23  ;;  %v1904_v37 = vmul.f32 1.442695, %v1902_v31 }
 0x47f   : > { %5116 = vpow2.f32 %v1910_v25 }
 0x486   : > { %v1893_v24 = vpop.xlane.xlu0 %1892 }
 0x48a   : > { %v2007_v26 = vpop.permute.xlu0 %2006  ;;  %v1899_v28 = vpop.xlane.xlu1 %1898 }
 0x48b   : > { %v1901_v30 = vmax.f32 %v1893_v24, %v1899_v28  ;;  %4827 = vmatpush3.msra.mxu1 %v2007_v26 }
 0x48c   : > { %4838 = vmatprep.subr.mxu1 %v5461_v0  ;;  %v6018_v53 = vpop.eup %5116 }
 0x48d   : > { %v1909_v32 = vsub.f32 %v1884_v15, %v1901_v30  ;;  %v1903_v41 = vsub.f32 %v1736_v11, %v1901_v30 }
 0x48e   : > { %v2251_v34 = vpop.permute.xlu0 %2250  ;;  %v2253_v35 = vpop.permute.xlu1 %2252 }
 0x48f   : > { %v1912_v36 = vmul.f32 1.442695, %v1909_v32  ;;  %v1906_v50 = vmul.f32 1.442695, %v1903_v41 }
 0x491   : > { %5118 = vpow2.f32 %v1912_v36 }
 0x492   : > { %v2335_v40 = vpop.permute.xlu0 %2334  ;;  %v2249_v42 = vpop.permute.xlu1 %2248  ;;  %5120 = vpow2.f32 %v1904_v37 }
 0x493   : > { %5122 = vpow2.f32 %v1906_v50 }
 0x496   : > { %v2331_v52 = vpop.permute.xlu0 %2330  ;;  %v2333_v59 = vpop.permute.xlu1 %2332 }
 0x49a   : > { %v1930_v60 = vpop.permute.xlu0 %1929  ;;  %v2487_v62 = vpop.permute.xlu1 %2486 }
 0x49b   : > { %4822 = vmatpush3.msra.mxu0 %v1930_v60 }
 0x49c   : > { %4824 = vmatmul.mubr.msk.f32.vlgmr.msra.gmra.mxu0 %vm1245_vm3, %v6018_v53  ;;  %4831 = vmatprep.subr.mxu0 %v5461_v0 }
 0x49d   : > { %4835 = vmatprep.mubr.msk.f32.mxu0 %vm5462_vm0, %v5461_v0 }
 0x49e   : > { %v2087_v1 = vpop.permute.xlu1 %2086  ;;  %v6025_v2 = vpop.eup %5118 }
 0x49f   : > { %4832 = vmatpush3.msra.mxu0 %v2087_v1  ;;  %v2085_v3 = vpop.permute.xlu0 %2084  ;;  %4829 = vmatmul.mubr.msk.f32.vlgmr.msra.gmra.mxu1 %vm1245_vm3, %v6025_v2  ;;  %v6030_v4 = vpop.eup %5120 }
 0x4a0   : > { %4833 = vmatprep.subr.mxu0 %v5461_v0  ;;  %4839 = vmatpush3.msra.mxu1 %v2168_v20  ;;  %v6037_v7 = vpop.eup %5122 }
 0x4a1   : > { %4834 = vmatpush3.msra.mxu0 %v2085_v3  ;;  %4840 = vmatprep.subr.mxu1 %v5461_v0 }
 0x4a2   : > { %4836 = vmatmul.mubr.msk.f32.vlgmr.msra.gmra.mxu0 %vm1238_vm2, %v6030_v4  ;;  %v2413_v5 = vpop.permute.xlu1 %2412  ;;  %4841 = vmatpush3.msra.mxu1 %v2166_v22 }
 0x4a3   : > { %4842 = vmatprep.mubr.msk.f32.mxu1 %vm5462_vm0, %v5461_v0  ;;  %4845 = vmatprep.subr.mxu1 %v5461_v0 }
 0x4a4   : > { %4859 = vmatprep.subr.mxu0 %v5461_v0  ;;  %4843 = vmatmul.mubr.msk.f32.vlgmr.msra.gmra.mxu1 %vm1238_vm2, %v6037_v7 }
 0x4a5   : > { %4860 = vmatpush3.xpose.msk.msra.mxu0 %vm933_vm1, %v2413_v5  ;;  %4846 = vmatpush3.xpose.msk.msra.mxu1 %vm933_vm1, %v2253_v35 }
 0x4a6   : > { %4861 = vmatprep.mubr.msk.f32.mxu0 %vm5462_vm0, %v5461_v0  ;;  %4847 = vmatprep.subr.mxu1 %v5461_v0 }
 0x4a7   : > { %4849 = vmatprep.mubr.msk.f32.mxu1 %vm5462_vm0, %v5461_v0  ;;  %4869 = vmatprep.subr.mxu0 %v5461_v0 }
 0x4a8   : > { %4862 = vmatmul.mubr.msk.f32.vlgmr.msra.gmra.mxu0 %vm933_vm1, %v2249_v42 }
 0x4a9   : > { %4871 = vmatprep.mubr.msk.f32.mxu0 %vm5462_vm0, %v5461_v0  ;;  %4848 = vmatpush3.xpose.msk.msra.mxu1 %vm933_vm1, %v2251_v34 }
 0x4aa   : > { %4852 = vmatprep.subr.mxu1 %v5461_v0 }
 0x4ac   : > { %4850 = vmatmul.mubr.msk.f32.vlgmr.msra.gmra.mxu1 %vm933_vm1, %v2249_v42 }
 0x4ad   : > { %4853 = vmatpush3.xpose.msk.msra.mxu1 %vm933_vm1, %v2335_v40  ;;  %4856 = vmatprep.mubr.msk.f32.mxu1 %vm5462_vm0, %v5461_v0 }
 0x4ae   : > { %4854 = vmatprep.subr.mxu1 %v5461_v0 }
 0x4b1   : > { %4855 = vmatpush3.xpose.msk.msra.mxu1 %vm933_vm1, %v2333_v59 }
 0x4b2   : > { %4864 = vmatprep.subr.mxu1 %v5461_v0 }
 0x4b4   : > { %4857 = vmatmul.mubr.msk.f32.vlgmr.msra.gmra.mxu1 %vm933_vm1, %v2331_v52 }
 0x4b5   : > { %4865 = vmatpush3.xpose.msk.msra.mxu1 %vm933_vm1, %v2487_v62  ;;  %4866 = vmatprep.mubr.msk.f32.mxu1 %vm5462_vm0, %v5461_v0 }
 0x4b6   : > { %4874 = vmatprep.subr.mxu1 %v5461_v0 }
 0x4b8   : > { %4867 = vmatmul.mubr.msk.f32.vlgmr.msra.gmra.mxu1 %vm933_vm1, %v2331_v52 }
 0x4b9   : > { %4876 = vmatprep.mubr.msk.f32.mxu1 %vm5462_vm0, %v5461_v0 }
 0x55c   : > { %v2001_v8 = vpop.f32.mrf.mxu0 }
 0x55e   : > { %v4825_v10 = vpop.f32.mrf.mxu0 }
 0x55f   : > { %v2078_v11 = vpop.f32.mrf.mxu1 }
 0x561   : > { %v4830_v12 = vpop.f32.mrf.mxu1 }
 0x562   : > { %v2159_v13 = vpop.f32.mrf.mxu0 }
 0x563   : > { %v6071_v15 = vadd.f32 %v2159_v13, %v2001_v8 }
 0x564   : > { %v4837_v16 = vpop.f32.mrf.mxu0  ;;  %v2240_v17 = vpop.f32.mrf.mxu1 }
 0x565   : > { %v6073_v18 = vadd.f32 %v2240_v17, %v2078_v11 }
 0x566   : > { %v4844_v19 = vpop.f32.mrf.mxu1 }
 0x568   : > { %v2482_v20 = vpop.f32.mrf.mxu0 }
 0x569   : > { %v2566_v21 = vsel %vm1245_vm3, %v2482_v20, -inf }
 0x56a   : > { %2567 = vmax.xlane.f32.xlu0 %v2566_v21  ;;  %v4863_v22 = vpop.f32.mrf.mxu0 }
 0x56c   : > { %v2326_v23 = vpop.f32.mrf.mxu1 }
 0x56d   : > { %v2560_v24 = vsel %vm1238_vm2, %v2326_v23, -inf }
 0x56e   : > { %2561 = vmax.xlane.f32.xlu0 %v2560_v24  ;;  %v4851_v25 = vpop.f32.mrf.mxu1 }
 0x574   : > { %v2408_v26 = vpop.f32.mrf.mxu1 }
 0x575   : > { %v2563_v28 = vsel %vm1238_vm2, %v2408_v26, -inf }
 0x576   : > { %2564 = vmax.xlane.f32.xlu0 %v2563_v28  ;;  %v4858_v30 = vpop.f32.mrf.mxu1 }
 0x578   : > { %v2556_v31 = vpop.f32.mrf.mxu1 }
 0x579   : > { %v2569_v32 = vsel %vm1245_vm3, %v2556_v31, -inf }
 0x57a   : > { %2570 = vmax.xlane.f32.xlu1 %v2569_v32  ;;  %v4868_v34 = vpop.f32.mrf.mxu1 }
 0x58b   : > { %2914 = vrot.lane.b32.xlu1 %v5843_v49, %s5465_s19  ;;  %v2834_v49 = vpop.permute.xlu1 %2833 }
 0x58c   : > { %2676 = vrot.lane.b32.xlu0 %v5888_v61, %s5464_s22 }
 0x58f   : > { %2600 = vrot.lane.b32.xlu1 %v5890_v63, %s5464_s22 }
 0x590   : > { %2916 = vrot.lane.b32.xlu0 %v5836_v46, %s5465_s19 }
 0x593   : > { %2998 = vrot.lane.b32.xlu1 %v5856_v54, %s5465_s19 }
 0x594   : > { %3000 = vrot.lane.b32.xlu0 %v5846_v51, %s5465_s19  ;;  %v2832_v51 = vpop.permute.xlu1 %2831 }
 0x597   : > { %2996 = vrot.lane.b32.xlu1 %v5860_v55, %s5465_s19 }
 0x598   : > { %2754 = vrot.lane.b32.xlu0 %v5831_v43, %s5464_s22  ;;  %v2919_v55 = vpop.permute.xlu1 %2918 }
 0x59b   : > { %3152 = vrot.lane.b32.xlu1 %v5872_v57, %s5465_s19 }
 0x59c   : > { %2752 = vrot.lane.b32.xlu0 %v5825_v38, %s5464_s22 }
 0x5a0   : > { %3078 = vrot.lane.b32.xlu0 %v5863_v56, %s5465_s19 }
 0x5f3   : > { %v2568_v46 = vpop.xlane.xlu0 %2567 }
 0x5f7   : > { %v2562_v54 = vpop.xlane.xlu0 %2561 }
 0x5f8   : > { %v2572_v35 = vmax.f32 %v2562_v54, %v2568_v46 }
 0x5fa   : > { %v2580_v41 = vsub.f32 %v2482_v20, %v2572_v35  ;;  %v2574_v37 = vsub.f32 %v2326_v23, %v2572_v35 }
 0x5fc   : > { %v2582_v36 = vmul.f32 1.442695, %v2580_v41  ;;  %v2576_v42 = vmul.f32 1.442695, %v2574_v37 }
 0x5fe   : > { %5124 = vpow2.f32 %v2582_v36 }
 0x5ff   : > { %v2565_v40 = vpop.xlane.xlu0 %2564  ;;  %5126 = vpow2.f32 %v2576_v42 }
 0x603   : > { %v2677_v50 = vpop.permute.xlu0 %2676  ;;  %v2571_v57 = vpop.xlane.xlu1 %2570 }
 0x604   : > { %v2573_v52 = vmax.f32 %v2565_v40, %v2571_v57  ;;  %4875 = vmatpush3.msra.mxu1 %v2677_v50 }
 0x605   : > { %4886 = vmatprep.subr.mxu1 %v5461_v0 }
 0x606   : > { %v2581_v59 = vsub.f32 %v2556_v31, %v2573_v52  ;;  %v2575_v56 = vsub.f32 %v2408_v26, %v2573_v52 }
 0x607   : > { %v2917_v60 = vpop.permute.xlu0 %2916  ;;  %v2915_v62 = vpop.permute.xlu1 %2914 }
 0x608   : > { %v2584_v1 = vmul.f32 1.442695, %v2581_v59  ;;  %v2578_v3 = vmul.f32 1.442695, %v2575_v56 }
 0x60a   : > { %5128 = vpow2.f32 %v2584_v1 }
 0x60b   : > { %v3001_v5 = vpop.permute.xlu0 %3000  ;;  %v2601_v8 = vpop.permute.xlu1 %2600  ;;  %5130 = vpow2.f32 %v2578_v3 }
 0x60c   : > { %v6102_v10 = vpop.eup %5124  ;;  %4870 = vmatpush3.msra.mxu0 %v2601_v8 }
 0x60d   : > { %4872 = vmatmul.mubr.msk.f32.vlgmr.msra.gmra.mxu0 %vm1245_vm3, %v6102_v10  ;;  %4879 = vmatprep.subr.mxu0 %v5461_v0  ;;  %v6110_v13 = vpop.eup %5126 }
 0x60e   : > { %4883 = vmatprep.mubr.msk.f32.mxu0 %vm5462_vm0, %v5461_v0 }
 0x60f   : > { %v2755_v11 = vpop.permute.xlu0 %2754  ;;  %v2999_v20 = vpop.permute.xlu1 %2998 }
 0x610   : > { %4880 = vmatpush3.msra.mxu0 %v2755_v11 }
 0x611   : > { %4881 = vmatprep.subr.mxu0 %v5461_v0 }
 0x613   : > { %v2753_v12 = vpop.permute.xlu0 %2752  ;;  %v2997_v21 = vpop.permute.xlu1 %2996 }
 0x614   : > { %4882 = vmatpush3.msra.mxu0 %v2753_v12 }
 0x615   : > { %4884 = vmatmul.mubr.msk.f32.vlgmr.msra.gmra.mxu0 %vm1238_vm2, %v6110_v13  ;;  %4907 = vmatprep.subr.mxu0 %v5461_v0 }
 0x616   : > { %4909 = vmatprep.mubr.msk.f32.mxu0 %vm5462_vm0, %v5461_v0 }
 0x617   : > { %v3079_v16 = vpop.permute.xlu0 %3078  ;;  %v6117_v17 = vpop.eup %5128 }
 0x618   : > { %4908 = vmatpush3.xpose.msk.msra.mxu0 %vm933_vm1, %v3079_v16  ;;  %4877 = vmatmul.mubr.msk.f32.vlgmr.msra.gmra.mxu1 %vm1245_vm3, %v6117_v17  ;;  %v6127_v19 = vpop.eup %5130  ;;  %v3153_v22 = vpop.permute.xlu1 %3152 }
 0x619   : > { %4917 = vmatprep.subr.mxu0 %v5461_v0  ;;  %4887 = vmatpush3.msra.mxu1 %v2834_v49  ;;  %v2589_v52 = vsel %vm1238_vm2, %v6127_v19, 0.0 }
 0x61a   : > { %4890 = vmatprep.mubr.msk.f32.mxu1 %vm5462_vm0, %v5461_v0  ;;  %4888 = vmatprep.subr.mxu1 %v5461_v0 }
 0x61b   : > { %4910 = vmatmul.mubr.msk.f32.vlgmr.msra.gmra.mxu0 %vm933_vm1, %v2915_v62  ;;  %4889 = vmatpush3.msra.mxu1 %v2832_v51 }
 0x61c   : > { %4919 = vmatprep.mubr.msk.f32.mxu0 %vm5462_vm0, %v5461_v0  ;;  %4893 = vmatprep.subr.mxu1 %v5461_v0 }
 0x61d   : > { %4891 = vmatmul.mubr.msk.f32.vlgmr.msra.gmra.mxu1 %vm1238_vm2, %v6127_v19 }
 0x61e   : > { %4894 = vmatpush3.xpose.msk.msra.mxu1 %vm933_vm1, %v2919_v55  ;;  %4897 = vmatprep.mubr.msk.f32.mxu1 %vm5462_vm0, %v5461_v0 }
 0x61f   : > { %4895 = vmatprep.subr.mxu1 %v5461_v0 }
 0x622   : > { %4896 = vmatpush3.xpose.msk.msra.mxu1 %vm933_vm1, %v2917_v60 }
 0x623   : > { %4900 = vmatprep.subr.mxu1 %v5461_v0 }
 0x625   : > { %4898 = vmatmul.mubr.msk.f32.vlgmr.msra.gmra.mxu1 %vm933_vm1, %v2915_v62 }
 0x626   : > { %4901 = vmatpush3.xpose.msk.msra.mxu1 %vm933_vm1, %v3001_v5  ;;  %4904 = vmatprep.mubr.msk.f32.mxu1 %vm5462_vm0, %v5461_v0 }
 0x627   : > { %4902 = vmatprep.subr.mxu1 %v5461_v0 }
 0x62a   : > { %4903 = vmatpush3.xpose.msk.msra.mxu1 %vm933_vm1, %v2999_v20 }
 0x62b   : > { %4912 = vmatprep.subr.mxu1 %v5461_v0 }
 0x62d   : > { %4905 = vmatmul.mubr.msk.f32.vlgmr.msra.gmra.mxu1 %vm933_vm1, %v2997_v21 }
 0x62e   : > { %4913 = vmatpush3.xpose.msk.msra.mxu1 %vm933_vm1, %v3153_v22  ;;  %4914 = vmatprep.mubr.msk.f32.mxu1 %vm5462_vm0, %v5461_v0 }
 0x62f   : > { %4922 = vmatprep.subr.mxu1 %v5461_v0 }
 0x631   : > { %4915 = vmatmul.mubr.msk.f32.vlgmr.msra.gmra.mxu1 %vm933_vm1, %v2997_v21 }
 0x632   : > { %4924 = vmatprep.mubr.msk.f32.mxu1 %vm5462_vm0, %v5461_v0 }
 0x6cd   : > { %v2672_v23 = vpop.f32.mrf.mxu0 }
 0x6cf   : > { %v4873_v24 = vpop.f32.mrf.mxu0 }
 0x6d5   : > { %v2827_v25 = vpop.f32.mrf.mxu0 }
 0x6d6   : > { %v6155_v26 = vadd.f32 %v2827_v25, %v2672_v23 }
 0x6d7   : > { %v4885_v28 = vpop.f32.mrf.mxu0 }
 0x6d8   : > { %v2748_v30 = vpop.f32.mrf.mxu1 }
 0x6da   : > { %v4878_v31 = vpop.f32.mrf.mxu1 }
 0x6db   : > { %v3148_v32 = vpop.f32.mrf.mxu0 }
 0x6dc   : > { %v3232_v34 = vsel %vm1245_vm3, %v3148_v32, -inf }
 0x6dd   : > { %v2906_v46 = vpop.f32.mrf.mxu1  ;;  %3233 = vmax.xlane.f32.xlu1 %v3232_v34  ;;  %v4911_v49 = vpop.f32.mrf.mxu0  ;;  %v1266_v34 = vsel %vm1238_vm2, %v5947_v45, 0.0 }
 0x6de   : > { %v6158_v54 = vadd.f32 %v2906_v46, %v2748_v30  ;;  %v1272_v46 = vsel %vm1245_vm3, %v5923_v39, 0.0  ;;  %v1269_v49 = vsel %vm1238_vm2, %v5959_v47, 0.0 }
 0x6df   : > { %v4892_v35 = vpop.f32.mrf.mxu1 }
 0x6e0   : > { %v1275_v35 = vsel %vm1245_vm3, %v5934_v44, 0.0 }
 0x6e5   : > { %v2992_v51 = vpop.f32.mrf.mxu1 }
 0x6e6   : > { %v3226_v41 = vsel %vm1238_vm2, %v2992_v51, -inf }
 0x6e7   : > { %3227 = vmax.xlane.f32.xlu0 %v3226_v41  ;;  %v4899_v36 = vpop.f32.mrf.mxu1 }
 0x6ed   : > { %v3074_v55 = vpop.f32.mrf.mxu1 }
 0x6ee   : > { %v3229_v37 = vsel %vm1238_vm2, %v3074_v55, -inf  ;;  %3342 = vrot.lane.b32.xlu1 %v5888_v61, %s5465_s19  ;;  %v1920_v61 = vsel %vm1245_vm3, %v6018_v53, 0.0  ;;  %v2586_v53 = vsel %vm1238_vm2, %v6110_v13, 0.0 }
 0x6ef   : > { %3230 = vmax.xlane.f32.xlu0 %v3229_v37  ;;  %v4906_v40 = vpop.f32.mrf.mxu1 }
 0x6f1   : > { %v3222_v42 = vpop.f32.mrf.mxu1 }
 0x6f2   : > { %v3235_v50 = vsel %vm1245_vm3, %v3222_v42, -inf  ;;  %3420 = vrot.lane.b32.xlu1 %v5831_v43, %s5465_s19  ;;  %v2592_v43 = vsel %vm1245_vm3, %v6102_v10, 0.0 }
 0x6f3   : > { %3236 = vmax.xlane.f32.xlu0 %v3235_v50  ;;  %v4916_v57 = vpop.f32.mrf.mxu1 }
 0x6f6   : > { %3499 = vrot.lane.b32.xlu1 %v5915_v14, %s5465_s19  ;;  %v2595_v14 = vsel %vm1245_vm3, %v6117_v17, 0.0 }
 0x6fa   : > { %3497 = vrot.lane.b32.xlu1 %v5839_v48, %s5465_s19  ;;  %v1914_v48 = vsel %vm1238_vm2, %v6030_v4, 0.0 }
 0x709   : > { %3266 = vrot.lane.b32.xlu0 %v5890_v63, %s5465_s19  ;;  %v1917_v63 = vsel %vm1238_vm2, %v6037_v7, 0.0 }
 0x70d   : > { %3418 = vrot.lane.b32.xlu0 %v5825_v38, %s5465_s19  ;;  %v1923_v38 = vsel %vm1245_vm3, %v6025_v2, 0.0 }
 0x71e   : > { %1921 = vadd.xlane.f32.xlu1 %v1920_v61 }
 0x722   : > { %2593 = vadd.xlane.f32.xlu1 %v2592_v43 }
 0x726   : > { %2596 = vadd.xlane.f32.xlu1 %v2595_v14 }
 0x72c   : > { %1915 = vadd.xlane.f32.xlu0 %v1914_v48 }
 0x730   : > { %1918 = vadd.xlane.f32.xlu0 %v1917_v63 }
 0x734   : > { %1924 = vadd.xlane.f32.xlu0 %v1923_v38 }
 0x738   : > { %2587 = vadd.xlane.f32.xlu0 %v2586_v53 }
 0x73c   : > { %2590 = vadd.xlane.f32.xlu0 %v2589_v52 }
 0x766   : > { %v3234_v59 = vpop.xlane.xlu1 %3233 }
 0x76a   : > { %v3343_v56 = vpop.permute.xlu1 %3342 }
 0x76b   : > { %4923 = vmatpush3.msra.mxu1 %v3343_v56  ;;  %v3627_v56 = vld [vmem:[#allocation10 + $0x78] sm:$0xff] }
 0x76c   : > { %4934 = vmatprep.subr.mxu1 %v5461_v0 }
 0x76e   : > { %v3421_v21 = vpop.permute.xlu1 %3420 }
 0x770   : > { %v3228_v4 = vpop.xlane.xlu0 %3227 }
 0x771   : > { %v3238_v7 = vmax.f32 %v3228_v4, %v3234_v59  ;;  %v3626_v4 = vld [vmem:[#allocation10 + $0x70] sm:$0xff] }
 0x772   : > { %v3500_v24 = vpop.permute.xlu1 %3499 }
 0x773   : > { %v3240_v60 = vsub.f32 %v2992_v51, %v3238_v7  ;;  %v3246_v62 = vsub.f32 %v3148_v32, %v3238_v7  ;;  %v3625_v7 = vld [vmem:[#allocation10 + $0x68] sm:$0xff] }
 0x775   : > { %v3242_v1 = vmul.f32 1.442695, %v3240_v60  ;;  %v3248_v2 = vmul.f32 1.442695, %v3246_v62  ;;  %v3622_v60 = vld [vmem:[#allocation10 + $0x50] sm:$0xff]  ;;  %v3619_v62 = vld [vmem:[#allocation10 + $0x38] sm:$0xff] }
 0x776   : > { %v3498_v32 = vpop.permute.xlu1 %3497 }
 0x777   : > { %5132 = vpow2.f32 %v3242_v1  ;;  %v3618_v1 = vld [vmem:[#allocation10 + $0x30] sm:$0xff] }
 0x778   : > { %5134 = vpow2.f32 %v3248_v2  ;;  %v3231_v3 = vpop.xlane.xlu0 %3230  ;;  %v3617_v2 = vld [vmem:[#allocation10 + $0x28] sm:$0xff] }
 0x77c   : > { %v3237_v5 = vpop.xlane.xlu0 %3236 }
 0x77d   : > { %v3239_v8 = vmax.f32 %v3231_v3, %v3237_v5  ;;  %v3616_v3 = vld [vmem:[#allocation10 + $0x20] sm:$0xff]  ;;  %v3615_v5 = vld [vmem:[#allocation10 + $0x18] sm:$0xff] }
 0x77f   : > { %v3241_v10 = vsub.f32 %v3074_v55, %v3239_v8  ;;  %v3247_v11 = vsub.f32 %v3222_v42, %v3239_v8  ;;  %v3614_v8 = vld [vmem:[#allocation10 + $0x10] sm:$0xff] }
 0x780   : > { %v3267_v12 = vpop.permute.xlu0 %3266 }
 0x781   : > { %v3244_v13 = vmul.f32 1.442695, %v3241_v10  ;;  %v3250_v16 = vmul.f32 1.442695, %v3247_v11  ;;  %4918 = vmatpush3.msra.mxu0 %v3267_v12 }
 0x782   : > { %4927 = vmatprep.subr.mxu0 %v5461_v0 }
 0x783   : > { %5136 = vpow2.f32 %v3244_v13 }
 0x784   : > { %v5133_v17 = vpop.eup %5132  ;;  %5138 = vpow2.f32 %v3250_v16  ;;  %v3419_v23 = vpop.permute.xlu0 %3418 }
 0x785   : > { %v5135_v19 = vpop.eup %5134  ;;  %v3252_v20 = vsel %vm1238_vm2, %v5133_v17, 0.0 }
 0x786   : > { %4920 = vmatmul.mubr.msk.f32.vlgmr.msra.gmra.mxu0 %vm1245_vm3, %v5135_v19  ;;  %v3258_v22 = vsel %vm1245_vm3, %v5135_v19, 0.0  ;;  %3253 = vadd.xlane.f32.xlu0 %v3252_v20 }
 0x787   : > { %4928 = vmatpush3.msra.mxu0 %v3421_v21  ;;  %3259 = vadd.xlane.f32.xlu1 %v3258_v22 }
 0x788   : > { %4929 = vmatprep.subr.mxu0 %v5461_v0  ;;  %4931 = vmatprep.mubr.msk.f32.mxu0 %vm5462_vm0, %v5461_v0 }
 0x789   : > { %4930 = vmatpush3.msra.mxu0 %v3419_v23  ;;  %v3613_v23 = vld [vmem:[#allocation10 + $0x8] sm:$0xff] }
 0x78a   : > { %4932 = vmatmul.mubr.msk.f32.vlgmr.msra.gmra.mxu0 %vm1238_vm2, %v5133_v17  ;;  %4941 = vmatprep.subr.mxu0 %v3627_v56 }
 0x78b   : > { %4942 = vmatpush3.msra.mxu0 %v3627_v56 }
 0x78c   : > { %4943 = vmatprep.subr.mxu0 %v3626_v4 }
 0x78d   : > { %4944 = vmatpush3.msra.mxu0 %v3626_v4 }
 0x78e   : > { %4945 = vmatprep.subr.mxu0 %v3625_v7 }
 0x78f   : > { %4946 = vmatpush3.msra.mxu0 %v3625_v7 }
 0x790   : > { %v5137_v25 = vpop.eup %5136 }
 0x791   : > { %v5139_v28 = vpop.eup %5138  ;;  %v3255_v30 = vsel %vm1238_vm2, %v5137_v25, 0.0 }
 0x792   : > { %4925 = vmatmul.mubr.msk.f32.vlgmr.msra.gmra.mxu1 %vm1245_vm3, %v5139_v28  ;;  %v3261_v31 = vsel %vm1245_vm3, %v5139_v28, 0.0  ;;  %3256 = vadd.xlane.f32.xlu0 %v3255_v30 }
 0x793   : > { %4935 = vmatpush3.msra.mxu1 %v3500_v24  ;;  %3262 = vadd.xlane.f32.xlu1 %v3261_v31  ;;  %v3612_v24 = vld [vmem:[#allocation10] sm:$0xff] }
 0x794   : > { %4936 = vmatprep.subr.mxu1 %v5461_v0  ;;  %4938 = vmatprep.mubr.msk.f32.mxu1 %vm5462_vm0, %v5461_v0 }
 0x795   : > { %4937 = vmatpush3.msra.mxu1 %v3498_v32 }
 0x796   : > { %4939 = vmatmul.mubr.msk.f32.vlgmr.msra.gmra.mxu1 %vm1238_vm2, %v5137_v25  ;;  %1267 = vadd.xlane.f32.xlu0 %v1266_v34 }
 0x797   : > { %1273 = vadd.xlane.f32.xlu1 %v1272_v46  ;;  %3886 = vmatprep.mubr.f32.mxu1 %v5461_v0 }
 0x79a   : > { %1270 = vadd.xlane.f32.xlu0 %v1269_v49 }
 0x79b   : > { %1276 = vadd.xlane.f32.xlu1 %v1275_v35 }
 0x7a7   : > { %v1922_v41 = vpop.xlane.xlu1 %1921 }
 0x7ab   : > { %v2594_v39 = vpop.xlane.xlu1 %2593 }
 0x7af   : > { %v2597_v50 = vpop.xlane.xlu1 %2596 }
 0x7b5   : > { %v1916_v51 = vpop.xlane.xlu0 %1915 }
 0x7b6   : > { %v1926_v36 = vadd.f32 %v1922_v41, %v1916_v51 }
 0x7b8   : > { %5140 = vrcp.f32 %v1926_v36 }
 0x7b9   : > { %v1919_v45 = vpop.xlane.xlu0 %1918 }
 0x7bd   : > { %v1925_v55 = vpop.xlane.xlu0 %1924 }
 0x7be   : > { %v1927_v37 = vadd.f32 %v1925_v55, %v1919_v45 }
 0x7c0   : > { %5142 = vrcp.f32 %v1927_v37 }
 0x7c1   : > { %v2588_v40 = vpop.xlane.xlu0 %2587 }
 0x7c2   : > { %v2598_v42 = vadd.f32 %v2594_v39, %v2588_v40 }
 0x7c4   : > { %5144 = vrcp.f32 %v2598_v42 }
 0x7c5   : > { %v2591_v57 = vpop.xlane.xlu0 %2590  ;;  %v5141_v61 = vpop.eup %5140 }
 0x7c6   : > { %v2599_v47 = vadd.f32 %v2597_v50, %v2591_v57  ;;  %v2246_v43 = vmul.f32 %v5141_v61, %v6071_v15  ;;  %v3624_v15 = vld [vmem:[#allocation10 + $0x60] sm:$0xff] }
 0x7c7   : > { %4947 = vmatprep.subr.mxu0 %v3624_v15 }
 0x7c8   : > { %5146 = vrcp.f32 %v2599_v47  ;;  %4948 = vmatpush3.msra.mxu0 %v3624_v15 }
 0x7cd   : > { %v5143_v44 = vpop.eup %5142 }
 0x7ce   : > { %v2247_v14 = vmul.f32 %v5143_v44, %v6073_v18  ;;  %v3623_v18 = vld [vmem:[#allocation10 + $0x58] sm:$0xff] }
 0x7cf   : > { %4949 = vmatprep.subr.mxu0 %v3623_v18 }
 0x7d0   : > { %v5093_v48 = vpack.i.bf16 %v2247_v14, %v2246_v43  ;;  %4950 = vmatpush3.msra.mxu0 %v3623_v18 }
 0x7d1   : > { %v5145_v63 = vpop.eup %5144  ;;  %4951 = vmatprep.subr.mxu0 %v3622_v60 }
 0x7d2   : > { %5094 = vrot.lane.b32.xlu0 %v5093_v48, %s5465_s19  ;;  %v2912_v53 = vmul.f32 %v5145_v63, %v6155_v26  ;;  %v3621_v26 = vld [vmem:[#allocation10 + $0x48] sm:$0xff]  ;;  %4952 = vmatpush3.msra.mxu0 %v3622_v60  ;;  %v3799_v60 = vld [vmem:[#allocation11 + $0x1f8] sm:$0xff]  ;;  %s5368_s19 = sshll.u32 %s5466_s14, 4  ;;  %s5369_s19 = int_to_ptr.vmem [resolvable:$false] %s5368_s19 }
 0x7d3   : > { %4953 = vmatprep.subr.mxu0 %v3621_v26  ;;  %s5370_s0 = scalar_lea.vmem %s5369_s19, 512 }
 0x7d4   : > { %4954 = vmatpush3.msra.mxu0 %v3621_v26  ;;  %v3798_v26 = vld [vmem:[#allocation11 + $0x1f0] sm:$0xff] }
 0x7d5   : > { %v5147_v38 = vpop.eup %5146 }
 0x7d6   : > { %v2913_v52 = vmul.f32 %v5147_v38, %v6158_v54  ;;  %v3620_v54 = vld [vmem:[#allocation10 + $0x40] sm:$0xff] }
 0x7d7   : > { %4955 = vmatprep.subr.mxu0 %v3620_v54 }
 0x7d8   : > { %v5098_v59 = vpack.i.bf16 %v2913_v52, %v2912_v53  ;;  %4956 = vmatpush3.msra.mxu0 %v3620_v54  ;;  %v3793_v54 = vld [vmem:[#allocation11 + $0x1c8] sm:$0xff] }
 0x7d9   : > { %4957 = vmatprep.subr.mxu0 %v3619_v62 }
 0x7da   : > { %5099 = vrot.lane.b32.xlu1 %v5098_v59, %s5464_s22  ;;  %4958 = vmatpush3.msra.mxu0 %v3619_v62  ;;  %v3795_v62 = vld [vmem:[#allocation11 + $0x1d8] sm:$0xff] }
 0x7db   : > { %4959 = vmatprep.subr.mxu0 %v3618_v1 }
 0x7dc   : > { %4960 = vmatpush3.msra.mxu0 %v3618_v1  ;;  %v3792_v1 = vld [vmem:[#allocation11 + $0x1c0] sm:$0xff] }
 0x7dd   : > { %4961 = vmatprep.subr.mxu0 %v3617_v2 }
 0x7de   : > { %4962 = vmatpush3.msra.mxu0 %v3617_v2  ;;  %v3794_v2 = vld [vmem:[#allocation11 + $0x1d0] sm:$0xff] }
 0x7df   : > { %4963 = vmatprep.subr.mxu0 %v3616_v3 }
 0x7e0   : > { %4964 = vmatpush3.msra.mxu0 %v3616_v3  ;;  %v3789_v3 = vld [vmem:[#allocation11 + $0x1a8] sm:$0xff] }
 0x7e1   : > { %4965 = vmatprep.subr.mxu0 %v3615_v5 }
 0x7e2   : > { %4966 = vmatpush3.msra.mxu0 %v3615_v5  ;;  %v3791_v5 = vld [vmem:[#allocation11 + $0x1b8] sm:$0xff] }
 0x7e3   : > { %4967 = vmatprep.subr.mxu0 %v3614_v8 }
 0x7e4   : > { %4968 = vmatpush3.msra.mxu0 %v3614_v8  ;;  %v3788_v8 = vld [vmem:[#allocation11 + $0x1a0] sm:$0xff] }
 0x7e5   : > { %4969 = vmatprep.subr.mxu0 %v3613_v23 }
 0x7e6   : > { %4970 = vmatpush3.msra.mxu0 %v3613_v23 }
 0x7e7   : > { %4971 = vmatprep.subr.mxu0 %v3612_v24 }
 0x7e8   : > { %4972 = vmatpush3.msra.mxu0 %v3612_v24 }
 0x7e9   : > { %3899 = vmatprep.subr.mxu0 %v3799_v60  ;;  %v3751_v60 = vld [vmem:[#allocation11 + $0x78] sm:$0xff] }
 0x80f   : > { %v3254_v11 = vpop.xlane.xlu0 %3253 }
 0x810   : > { %v3260_v10 = vpop.xlane.xlu1 %3259 }
 0x811   : > { %v3264_v16 = vadd.f32 %v3260_v10, %v3254_v11  ;;  %v3790_v10 = vld [vmem:[#allocation11 + $0x1b0] sm:$0xff]  ;;  %v3785_v11 = vld [vmem:[#allocation11 + $0x188] sm:$0xff] }
 0x813   : > { %5148 = vrcp.f32 %v3264_v16  ;;  %v3786_v16 = vld [vmem:[#allocation11 + $0x190] sm:$0xff] }
 0x81b   : > { %v3257_v13 = vpop.xlane.xlu0 %3256 }
 0x81c   : > { %v3263_v12 = vpop.xlane.xlu1 %3262 }
 0x81d   : > { %v3265_v19 = vadd.f32 %v3263_v12, %v3257_v13  ;;  %v3787_v12 = vld [vmem:[#allocation11 + $0x198] sm:$0xff]  ;;  %v3784_v13 = vld [vmem:[#allocation11 + $0x180] sm:$0xff] }
 0x81f   : > { %5150 = vrcp.f32 %v3265_v19  ;;  %v1268_v36 = vpop.xlane.xlu0 %1267 }
 0x820   : > { %v5149_v32 = vpop.eup %5148  ;;  %v1274_v45 = vpop.xlane.xlu1 %1273 }
 0x821   : > { %v1278_v39 = vadd.f32 %v1274_v45, %v1268_v36  ;;  %v3778_v45 = vld [vmem:[#allocation11 + $0x150] sm:$0xff]  ;;  %v3773_v36 = vld [vmem:[#allocation11 + $0x128] sm:$0xff] }
 0x823   : > { %v1271_v37 = vpop.xlane.xlu0 %1270  ;;  %5152 = vrcp.f32 %v1278_v39  ;;  %v3774_v39 = vld [vmem:[#allocation11 + $0x130] sm:$0xff] }
 0x824   : > { %v1277_v55 = vpop.xlane.xlu1 %1276 }
 0x825   : > { %v1279_v40 = vadd.f32 %v1277_v55, %v1271_v37  ;;  %v3775_v55 = vld [vmem:[#allocation11 + $0x138] sm:$0xff]  ;;  %v3772_v37 = vld [vmem:[#allocation11 + $0x120] sm:$0xff] }
 0x827   : > { %5154 = vrcp.f32 %v1279_v40  ;;  %v3769_v40 = vld [vmem:[#allocation11 + $0x108] sm:$0xff] }
 0x82c   : > { %v5151_v46 = vpop.eup %5150 }
 0x830   : > { %v5153_v50 = vpop.eup %5152 }
 0x831   : > { %v1574_v63 = vmul.f32 %v5153_v50, %v5981_v6  ;;  %v3796_v6 = vld [vmem:[#allocation11 + $0x1e0] sm:$0xff] }
 0x832   : > { %v3768_v50 = vld [vmem:[#allocation11 + $0x100] sm:$0xff] }
 0x834   : > { %v5155_v47 = vpop.eup %5154 }
 0x835   : > { %v1575_v48 = vmul.f32 %v5155_v47, %v5983_v9  ;;  %v3797_v9 = vld [vmem:[#allocation11 + $0x1e8] sm:$0xff] }
 0x836   : > { %3822 = vmatprep.subr.mxu1 %v3797_v9  ;;  %v3765_v47 = vld [vmem:[#allocation11 + $0xe8] sm:$0xff] }
 0x837   : > { %3823 = vmatpush1.msra.mxu1 %v3796_v6  ;;  %v3749_v9 = vld [vmem:[#allocation11 + $0x68] sm:$0xff]  ;;  %v3748_v6 = vld [vmem:[#allocation11 + $0x60] sm:$0xff] }
 0x838   : > { %3824 = vmatprep.subr.mxu1 %v3793_v54  ;;  %v3745_v54 = vld [vmem:[#allocation11 + $0x48] sm:$0xff] }
 0x839   : > { %3825 = vmatpush1.msra.mxu1 %v3792_v1  ;;  %v3744_v1 = vld [vmem:[#allocation11 + $0x40] sm:$0xff] }
 0x83a   : > { %3826 = vmatprep.subr.mxu1 %v3789_v3  ;;  %v3741_v3 = vld [vmem:[#allocation11 + $0x28] sm:$0xff] }
 0x83b   : > { %3827 = vmatpush1.msra.mxu1 %v3788_v8  ;;  %v3740_v8 = vld [vmem:[#allocation11 + $0x20] sm:$0xff] }
 0x83c   : > { %3828 = vmatprep.subr.mxu1 %v3785_v11  ;;  %v3737_v11 = vld [vmem:[#allocation11 + $0x8] sm:$0xff] }
 0x83d   : > { %3829 = vmatpush1.msra.mxu1 %v3784_v13  ;;  %v3736_v13 = vld [vmem:[#allocation11] sm:$0xff] }
 0x844   : > { %v5095_v42 = vpop.permute.xlu0 %5094 }
 0x845   : > { %v5097_v61 = vunpack.i.h.bf16 %v5095_v42  ;;  %v5096_v44 = vunpack.i.l.bf16 %v5095_v42  ;;  %v3771_v42 = vld [vmem:[#allocation11 + $0x118] sm:$0xff] }
 0x846   : > { %v3338_v17 = vpop.f32.mrf.mxu0 }
 0x847   : > { %v3605_v53 = vsel %vm933_vm1, %v1575_v48, %v5097_v61  ;;  %v3604_v56 = vsel %vm933_vm1, %v1574_v63, %v5096_v44  ;;  %v3767_v61 = vld [vmem:[#allocation11 + $0xf8] sm:$0xff]  ;;  %v3764_v44 = vld [vmem:[#allocation11 + $0xe0] sm:$0xff] }
 0x848   : > { %v4921_v20 = vpop.f32.mrf.mxu0  ;;  %v3763_v48 = vld [vmem:[#allocation11 + $0xd8] sm:$0xff]  ;;  %v3760_v63 = vld [vmem:[#allocation11 + $0xc0] sm:$0xff] }
 0x84a   : > { %v3493_v21 = vpop.f32.mrf.mxu0 }
 0x84b   : > { %v3494_v30 = vadd.f32 %v3493_v21, %v3338_v17  ;;  %v4510_v17 = vld [vmem:[%s6381_s7] ss:$0 sm:$0xff] }
 0x84c   : > { %v4933_v22 = vpop.f32.mrf.mxu0  ;;  %v5100_v57 = vpop.permute.xlu1 %5099 }
 0x84d   : > { %v3578_v35 = vmul.f32 %v5149_v32, %v3494_v30  ;;  %v5102_v43 = vunpack.i.h.bf16 %v5100_v57  ;;  %v5101_v14 = vunpack.i.l.bf16 %v5100_v57  ;;  %v6232_v22 = vld [vmem:[%s5766_s2 + $0x8] sm:$0xff]  ;;  %v3770_v57 = vld [vmem:[#allocation11 + $0x110] sm:$0xff] }
 0x84e   : > { %v3781_v32 = vld [vmem:[#allocation11 + $0x168] sm:$0xff] }
 0x84f   : > { %v3607_v4 = vsel %vm3606_vm4, %v3604_v56, %v5101_v14  ;;  %v3608_v7 = vsel %vm3606_vm4, %v3605_v53, %v5102_v43  ;;  %3830 = vmatprep.subr.mxu1 %v3781_v32  ;;  %v3766_v43 = vld [vmem:[#allocation11 + $0xf0] sm:$0xff]  ;;  %v3761_v14 = vld [vmem:[#allocation11 + $0xc8] sm:$0xff] }
 0x850   : > { %v3757_v53 = vld [vmem:[#allocation11 + $0xa8] sm:$0xff]  ;;  %v3758_v56 = vld [vmem:[#allocation11 + $0xb0] sm:$0xff] }
 0x852   : > { %v3414_v25 = vpop.f32.mrf.mxu1 }
 0x854   : > { %v4926_v28 = vpop.f32.mrf.mxu1 }
 0x856   : > { %v3572_v31 = vpop.f32.mrf.mxu1 }
 0x857   : > { %v3573_v34 = vadd.f32 %v3572_v31, %v3414_v25  ;;  %v6238_v25 = vld [vmem:[%s5766_s2] sm:$0xff]  ;;  %s4287_s2 = sshll.u32 %s571_s21, 4  ;;  %s6325_s2 = int_to_ptr.vmem [resolvable:$true] %s4287_s2 }
 0x858   : > { %v4940_v49 = vpop.f32.mrf.mxu1  ;;  %s5364_s22 = scalar_lea.vmem %s6325_s2, 256  ;;  %p5371_p1 = scmp.lt.s32.totalorder %s6325_s2, %s5369_s19 }
 0x859   : > { %v3579_v51 = vmul.f32 %v5151_v46, %v3573_v34  ;;  %v3783_v34 = vld [vmem:[#allocation11 + $0x178] sm:$0xff]  ;;  %v3780_v46 = vld [vmem:[#allocation11 + $0x160] sm:$0xff]  ;;  %v3782_v49 = vld [vmem:[#allocation11 + $0x170] sm:$0xff]  ;;  %p5365_p0 = scmp.ne.s32.totalorder %s6325_s2, %s5364_s22  ;;  %p5372_p4 = scmp.lt.s32.totalorder %s5370_s0, %s5364_s22 }
 0x85a   : > { %3831 = vmatpush1.msra.mxu1 %v3780_v46  ;;  %v4511_v46 = vld [vmem:[%s6382_s8] ss:$0 sm:$0xff] }
 0x85b   : > { %v5103_v41 = vpack.i.bf16 %v3579_v51, %v3578_v35  ;;  %v3777_v35 = vld [vmem:[#allocation11 + $0x148] sm:$0xff]  ;;  %v3779_v51 = vld [vmem:[#allocation11 + $0x158] sm:$0xff]  ;;  %p5366_p9 = pnand %p5365_p0, %p6436_p5  ;;  %p5373_p6 = por %p5372_p4, %p5371_p1 }
 0x85c   : > { %3832 = vmatprep.subr.mxu1 %v3777_v35 }
 0x85d   : > { %5104 = vrot.lane.b32.xlu1 %v5103_v41, %s5463_s24  ;;  %v3776_v41 = vld [vmem:[#allocation11 + $0x140] sm:$0xff]  ;;  %s6330_s24 = scalar_lea.hbm %s6435_s13, %s4521_s20  ;;  %p5367_p11 = pneg %p5366_p9 }
 0x85e   : > { %3833 = vmatpush1.msra.mxu1 %v3776_v41  ;;  %v4079_v41 = vld [vmem:[#allocation13 + $0xf8] sm:$0xff] }
 0x85f   : > { %3834 = vmatprep.subr.mxu1 %v3773_v36  ;;  %v4095_v36 = vld [vmem:[#allocation13 + $0x178] sm:$0xff]  ;;  %p5374_p8 = pnand %p5373_p6, %p5367_p11 }
 0x860   : > { %3835 = vmatpush1.msra.mxu1 %v3772_v37  ;;  %v4110_v37 = vld [vmem:[#allocation13 + $0x1f0] sm:$0xff] }
 0x861   : > { %3836 = vmatprep.subr.mxu1 %v3769_v40  ;;  %v4109_v40 = vld [vmem:[#allocation13 + $0x1e8] sm:$0xff] }
 0x862   : > { %3837 = vmatpush1.msra.mxu1 %v3768_v50  ;;  %v4093_v50 = vld [vmem:[#allocation13 + $0x168] sm:$0xff] }
 0x863   : > { %3838 = vmatprep.subr.mxu1 %v3765_v47  ;;  %v4108_v47 = vld [vmem:[#allocation13 + $0x1e0] sm:$0xff] }
 0x864   : > { %3839 = vmatpush1.msra.mxu1 %v3764_v44  ;;  %v4092_v44 = vld [vmem:[#allocation13 + $0x160] sm:$0xff] }
 0x865   : > { %3840 = vmatprep.subr.mxu1 %v3761_v14  ;;  %v4107_v14 = vld [vmem:[#allocation13 + $0x1d8] sm:$0xff] }
 0x866   : > { %3841 = vmatpush1.msra.mxu1 %v3760_v63  ;;  %v4091_v63 = vld [vmem:[#allocation13 + $0x158] sm:$0xff] }
 0x867   : > { %3842 = vmatprep.subr.mxu1 %v3757_v53  ;;  %v4106_v53 = vld [vmem:[#allocation13 + $0x1d0] sm:$0xff] }
 0x8cf   : > { %v5105_v38 = vpop.permute.xlu1 %5104 }
 0x8d0   : > { %v5107_v52 = vunpack.i.h.bf16 %v5105_v38  ;;  %v5106_v59 = vunpack.i.l.bf16 %v5105_v38  ;;  %v3762_v38 = vld [vmem:[#allocation11 + $0xd0] sm:$0xff] }
 0x8d2   : > { %v3610_v15 = vsel %vm3609_vm5, %v3607_v4, %v5106_v59  ;;  %v3611_v18 = vsel %vm3609_vm5, %v3608_v7, %v5107_v52  ;;  %v3759_v52 = vld [vmem:[#allocation11 + $0xb8] sm:$0xff]  ;;  %v3756_v59 = vld [vmem:[#allocation11 + $0xa0] sm:$0xff]  ;;  %v3753_v4 = vld [vmem:[#allocation11 + $0x88] sm:$0xff] }
 0x8d3   : > { %4973 = vmatprep.mubr.f32.mxu0 %v3610_v15  ;;  %v3755_v7 = vld [vmem:[#allocation11 + $0x98] sm:$0xff]  ;;  %v3752_v15 = vld [vmem:[#allocation11 + $0x80] sm:$0xff]  ;;  %3843 = vmatpush1.msra.mxu1 %v3756_v59  ;;  %v4090_v59 = vld [vmem:[#allocation13 + $0x150] sm:$0xff] }
 0x8d4   : > { %4974 = vmatmul.mubr.f32.vlgmr.msra.gmra.mxu0 %v3611_v18  ;;  %v3754_v18 = vld [vmem:[#allocation11 + $0x90] sm:$0xff]  ;;  %3844 = vmatprep.subr.mxu1 %v3753_v4  ;;  %v4105_v4 = vld [vmem:[#allocation13 + $0x1c8] sm:$0xff] }
 0x8d5   : > { %3963 = vmatprep.mubr.f32.mxu0 %v5461_v0  ;;  %3900 = vmatpush1.msra.mxu0 %v3798_v26  ;;  %v3750_v26 = vld [vmem:[#allocation11 + $0x70] sm:$0xff] }
 0x8d6   : > { %3901 = vmatprep.subr.mxu0 %v3795_v62  ;;  %3845 = vmatpush1.msra.mxu1 %v3752_v15  ;;  %v3747_v62 = vld [vmem:[#allocation11 + $0x58] sm:$0xff]  ;;  %v4089_v15 = vld [vmem:[#allocation13 + $0x148] sm:$0xff] }
 0x8d7   : > { %3902 = vmatpush1.msra.mxu0 %v3794_v2  ;;  %3846 = vmatprep.subr.mxu1 %v3749_v9  ;;  %v3746_v2 = vld [vmem:[#allocation11 + $0x50] sm:$0xff]  ;;  %v4104_v9 = vld [vmem:[#allocation13 + $0x1c0] sm:$0xff] }
 0x8d8   : > { %3903 = vmatprep.subr.mxu0 %v3791_v5  ;;  %3847 = vmatpush1.msra.mxu1 %v3748_v6  ;;  %v3743_v5 = vld [vmem:[#allocation11 + $0x38] sm:$0xff]  ;;  %v4088_v6 = vld [vmem:[#allocation13 + $0x140] sm:$0xff] }
 0x8d9   : > { %3904 = vmatpush1.msra.mxu0 %v3790_v10  ;;  %3848 = vmatprep.subr.mxu1 %v3745_v54  ;;  %v3742_v10 = vld [vmem:[#allocation11 + $0x30] sm:$0xff]  ;;  %v4103_v54 = vld [vmem:[#allocation13 + $0x1b8] sm:$0xff] }
 0x8da   : > { %3905 = vmatprep.subr.mxu0 %v3787_v12  ;;  %3849 = vmatpush1.msra.mxu1 %v3744_v1  ;;  %v3739_v12 = vld [vmem:[#allocation11 + $0x18] sm:$0xff] }
 0x8db   : > { %3906 = vmatpush1.msra.mxu0 %v3786_v16  ;;  %3850 = vmatprep.subr.mxu1 %v3741_v3  ;;  %v3738_v16 = vld [vmem:[#allocation11 + $0x10] sm:$0xff]  ;;  %v4087_v1 = vld [vmem:[#allocation13 + $0x138] sm:$0xff] }
 0x8dc   : > { %3907 = vmatprep.subr.mxu0 %v3783_v34  ;;  %3851 = vmatpush1.msra.mxu1 %v3740_v8  ;;  %v4102_v3 = vld [vmem:[#allocation13 + $0x1b0] sm:$0xff] }
 0x8dd   : > { %3908 = vmatpush1.msra.mxu0 %v3782_v49  ;;  %3852 = vmatprep.subr.mxu1 %v3737_v11  ;;  %v4086_v8 = vld [vmem:[#allocation13 + $0x130] sm:$0xff]  ;;  %v4101_v11 = vld [vmem:[#allocation13 + $0x1a8] sm:$0xff] }
 0x8de   : > { %3909 = vmatprep.subr.mxu0 %v3779_v51  ;;  %3853 = vmatpush1.msra.mxu1 %v3736_v13  ;;  %v4085_v13 = vld [vmem:[#allocation13 + $0x128] sm:$0xff] }
 0x8df   : > { %3910 = vmatpush1.msra.mxu0 %v3778_v45  ;;  %v4111_v45 = vld [vmem:[#allocation13 + $0x1f8] sm:$0xff]  ;;  %4638 = vmatprep.subr.mxu1 %v4079_v41  ;;  %v4049_v41 = vld [vmem:[#allocation13 + $0x8] sm:$0xff] }
 0x8e0   : > { %3911 = vmatprep.subr.mxu0 %v3775_v55  ;;  %v4078_v55 = vld [vmem:[#allocation13 + $0xf0] sm:$0xff] }
 0x8e1   : > { %3912 = vmatpush1.msra.mxu0 %v3774_v39  ;;  %v4094_v39 = vld [vmem:[#allocation13 + $0x170] sm:$0xff] }
 0x8e2   : > { %3913 = vmatprep.subr.mxu0 %v3771_v42  ;;  %v4061_v42 = vld [vmem:[#allocation13 + $0x68] sm:$0xff] }
 0x8e3   : > { %3914 = vmatpush1.msra.mxu0 %v3770_v57  ;;  %v4076_v57 = vld [vmem:[#allocation13 + $0xe0] sm:$0xff] }
 0x8e4   : > { %3915 = vmatprep.subr.mxu0 %v3767_v61  ;;  %v4060_v61 = vld [vmem:[#allocation13 + $0x60] sm:$0xff] }
 0x8e5   : > { %3916 = vmatpush1.msra.mxu0 %v3766_v43  ;;  %v4075_v43 = vld [vmem:[#allocation13 + $0xd8] sm:$0xff] }
 0x8e6   : > { %3917 = vmatprep.subr.mxu0 %v3763_v48  ;;  %v4059_v48 = vld [vmem:[#allocation13 + $0x58] sm:$0xff] }
 0x8e7   : > { %3918 = vmatpush1.msra.mxu0 %v3762_v38  ;;  %v4074_v38 = vld [vmem:[#allocation13 + $0xd0] sm:$0xff] }
 0x8e8   : > { %3919 = vmatprep.subr.mxu0 %v3759_v52  ;;  %v4058_v52 = vld [vmem:[#allocation13 + $0x50] sm:$0xff] }
 0x8e9   : > { %3920 = vmatpush1.msra.mxu0 %v3758_v56  ;;  %v4073_v56 = vld [vmem:[#allocation13 + $0xc8] sm:$0xff] }
 0x8ea   : > { %3921 = vmatprep.subr.mxu0 %v3755_v7  ;;  %v4057_v7 = vld [vmem:[#allocation13 + $0x48] sm:$0xff] }
 0x8eb   : > { %3922 = vmatpush1.msra.mxu0 %v3754_v18  ;;  %v4072_v18 = vld [vmem:[#allocation13 + $0xc0] sm:$0xff] }
 0x8ec   : > { %3923 = vmatprep.subr.mxu0 %v3751_v60  ;;  %v4056_v60 = vld [vmem:[#allocation13 + $0x40] sm:$0xff] }
 0x8ed   : > { %3924 = vmatpush1.msra.mxu0 %v3750_v26  ;;  %v4071_v26 = vld [vmem:[#allocation13 + $0xb8] sm:$0xff] }
 0x8ee   : > { %3925 = vmatprep.subr.mxu0 %v3747_v62  ;;  %v4055_v62 = vld [vmem:[#allocation13 + $0x38] sm:$0xff] }
 0x8ef   : > { %3926 = vmatpush1.msra.mxu0 %v3746_v2  ;;  %v4070_v2 = vld [vmem:[#allocation13 + $0xb0] sm:$0xff] }
 0x8f0   : > { %3927 = vmatprep.subr.mxu0 %v3743_v5  ;;  %v4054_v5 = vld [vmem:[#allocation13 + $0x30] sm:$0xff] }
 0x8f1   : > { %3928 = vmatpush1.msra.mxu0 %v3742_v10  ;;  %v4069_v10 = vld [vmem:[#allocation13 + $0xa8] sm:$0xff] }
 0x8f2   : > { %3929 = vmatprep.subr.mxu0 %v3739_v12  ;;  %v4053_v12 = vld [vmem:[#allocation13 + $0x28] sm:$0xff] }
 0x8f3   : > { %3930 = vmatpush1.msra.mxu0 %v3738_v16  ;;  %v4068_v16 = vld [vmem:[#allocation13 + $0xa0] sm:$0xff] }
 0x8f4   : > { %4676 = vmatprep.subr.mxu0 %v4111_v45  ;;  %v4081_v45 = vld [vmem:[#allocation13 + $0x108] sm:$0xff] }
 0x994   : > { %v4975_v19 = vpop.f32.mrf.mxu0 }
 0x995   : > { %v3707_v20 = vadd.f32 %v4975_v19, %v4510_v17 }
 0x996   : > { %v3701_v21 = vpop.f32.mrf.mxu0 }
 0x997   : > { %v6235_v23 = vadd.f32 %v6232_v22, %v3707_v20  ;;  %v3702_v24 = vadd.f32 %v4510_v17, %v3701_v21 }
 0x999   : > { %v6241_v28 = vadd.f32 %v6238_v25, %v3702_v24  ;;  %v3713_v30 = vmul.f32 %v6235_v23, %v6235_v23 }
 0x99b   : > { %3716 = vadd.xlane.f32.xlu0 %v3713_v30  ;;  %v3712_v31 = vmul.f32 %v6241_v28, %v6241_v28 }
 0x99d   : > { %3714 = vadd.xlane.f32.xlu1 %v3712_v31 }
 0xa24   : > { %v3717_v17 = vpop.xlane.xlu0 %3716 }
 0xa25   : > { %v3720_v19 = vmul.f32 0.0078125, %v3717_v17  ;;  %v4100_v17 = vld [vmem:[#allocation13 + $0x1a0] sm:$0xff] }
 0xa26   : > { %v3715_v20 = vpop.xlane.xlu1 %3714 }
 0xa27   : > { %v3722_v21 = vadd.f32 1e-06, %v3720_v19  ;;  %v3719_v24 = vmul.f32 0.0078125, %v3715_v20  ;;  %v4052_v19 = vld [vmem:[#allocation13 + $0x20] sm:$0xff] }
 0xa28   : > { %v4084_v20 = vld [vmem:[#allocation13 + $0x120] sm:$0xff] }
 0xa29   : > { %v3721_v30 = vadd.f32 1e-06, %v3719_v24  ;;  %5156 = vrsqrt.f32 %v3722_v21  ;;  %v4067_v21 = vld [vmem:[#allocation13 + $0x98] sm:$0xff] }
 0xa2a   : > { %v4099_v24 = vld [vmem:[#allocation13 + $0x198] sm:$0xff] }
 0xa2b   : > { %5158 = vrsqrt.f32 %v3721_v30  ;;  %v4051_v30 = vld [vmem:[#allocation13 + $0x18] sm:$0xff] }
 0xa36   : > { %v5157_v31 = vpop.eup %5156 }
 0xa37   : > { %v3726_v35 = vmul.f32 %v5157_v31, %v6235_v23  ;;  %v4062_v23 = vld [vmem:[#allocation13 + $0x70] sm:$0xff]  ;;  %v4083_v31 = vld [vmem:[#allocation13 + $0x118] sm:$0xff] }
 0xa38   : > { %v5159_v32 = vpop.eup %5158 }
 0xa39   : > { %v3725_v34 = vmul.f32 %v5159_v32, %v6241_v28  ;;  %v3735_v51 = vmul.f32 %v4511_v46, %v3726_v35  ;;  %v4063_v28 = vld [vmem:[#allocation13 + $0x78] sm:$0xff]  ;;  %v4066_v32 = vld [vmem:[#allocation13 + $0x90] sm:$0xff]  ;;  %v4065_v35 = vld [vmem:[#allocation13 + $0x88] sm:$0xff] }
 0xa3b   : > { %v3734_v49 = vmul.f32 %v4511_v46, %v3725_v34  ;;  %v4098_v34 = vld [vmem:[#allocation13 + $0x190] sm:$0xff] }
 0xa3c   : > { %v4050_v46 = vld [vmem:[#allocation13 + $0x10] sm:$0xff] }
 0xa3d   : > { %3887 = vmatmul.mubr.f32.vlgmr.msra.gmra.mxu1 %v3734_v49  ;;  %3964 = vmatmul.mubr.f32.vlgmr.msra.gmra.mxu0 %v3734_v49  ;;  %v4082_v49 = vld [vmem:[#allocation13 + $0x110] sm:$0xff] }
 0xa3e   : > { %3892 = vmatprep.mubr.f32.mxu1 %v5461_v0  ;;  %3969 = vmatprep.mubr.f32.mxu0 %v5461_v0  ;;  %v4077_v0 = vld [vmem:[#allocation13 + $0xe8] sm:$0xff] }
 0xa3f   : > { %4639 = vmatpush3.msra.mxu1 %v4063_v28  ;;  %4677 = vmatpush3.msra.mxu0 %v4095_v36  ;;  %v4064_v28 = vld [vmem:[#allocation13 + $0x80] sm:$0xff] }
 0xa40   : > { %4640 = vmatprep.subr.mxu1 %v4078_v55  ;;  %4678 = vmatprep.subr.mxu0 %v4110_v37  ;;  %v4096_v36 = vld [vmem:[#allocation13 + $0x180] sm:$0xff] }
 0xa41   : > { %3893 = vmatmul.mubr.f32.gmra.mxu1 %v3735_v51  ;;  %3970 = vmatmul.mubr.f32.gmra.mxu0 %v3735_v51  ;;  %v4097_v51 = vld [vmem:[#allocation13 + $0x188] sm:$0xff]  ;;  %v4048_v55 = vld [vmem:[#allocation13] sm:$0xff] }
 0xa42   : > { %4641 = vmatpush3.msra.mxu1 %v4062_v23  ;;  %4679 = vmatpush3.msra.mxu0 %v4094_v39  ;;  %v4080_v37 = vld [vmem:[#allocation13 + $0x100] sm:$0xff]  ;;  %v3816_v39 = vsub.s32 3, %v5806_v27 }
 0xa43   : > { %4642 = vmatprep.subr.mxu1 %v4077_v0  ;;  %4680 = vmatprep.subr.mxu0 %v4109_v40  ;;  %v3800_v23 = vld [vmem:[%s6384_s10] sm:$0xf] }
 0xa44   : > { %4643 = vmatpush3.msra.mxu1 %v4061_v42  ;;  %4681 = vmatpush3.msra.mxu0 %v4093_v50  ;;  %v3805_v0 = vrot.slane %v3800_v23, %v5818_v33  ;;  %v3813_v40 = vrot.slane %v3800_v23, %v641_v58  ;;  %v3809_v42 = vrot.slane %v3800_v23, %v5809_v29 }
 0xa45   : > { %4644 = vmatprep.subr.mxu1 %v4076_v57  ;;  %4682 = vmatprep.subr.mxu0 %v4108_v47  ;;  %v3817_v50 = vrot.slane %v3800_v23, %v3816_v39 }
 0xa46   : > { %4645 = vmatpush3.msra.mxu1 %v4060_v61  ;;  %4683 = vmatpush3.msra.mxu0 %v4092_v44 }
 0xa47   : > { %4646 = vmatprep.subr.mxu1 %v4075_v43  ;;  %4684 = vmatprep.subr.mxu0 %v4107_v14 }
 0xa48   : > { %4647 = vmatpush3.msra.mxu1 %v4059_v48  ;;  %4685 = vmatpush3.msra.mxu0 %v4091_v63 }
 0xa49   : > { %4648 = vmatprep.subr.mxu1 %v4074_v38  ;;  %4686 = vmatprep.subr.mxu0 %v4106_v53 }
 0xa4a   : > { %4649 = vmatpush3.msra.mxu1 %v4058_v52  ;;  %4687 = vmatpush3.msra.mxu0 %v4090_v59 }
 0xa4b   : > { %4650 = vmatprep.subr.mxu1 %v4073_v56  ;;  %4688 = vmatprep.subr.mxu0 %v4105_v4 }
 0xa4c   : > { %4651 = vmatpush3.msra.mxu1 %v4057_v7  ;;  %4689 = vmatpush3.msra.mxu0 %v4089_v15 }
 0xa4d   : > { %4652 = vmatprep.subr.mxu1 %v4072_v18  ;;  %4690 = vmatprep.subr.mxu0 %v4104_v9 }
 0xa4e   : > { %4653 = vmatpush3.msra.mxu1 %v4056_v60  ;;  %4691 = vmatpush3.msra.mxu0 %v4088_v6 }
 0xa4f   : > { %4654 = vmatprep.subr.mxu1 %v4071_v26  ;;  %4692 = vmatprep.subr.mxu0 %v4103_v54 }
 0xa50   : > { %4655 = vmatpush3.msra.mxu1 %v4055_v62  ;;  %4693 = vmatpush3.msra.mxu0 %v4087_v1 }
 0xa51   : > { %4656 = vmatprep.subr.mxu1 %v4070_v2  ;;  %4694 = vmatprep.subr.mxu0 %v4102_v3 }
 0xa52   : > { %4657 = vmatpush3.msra.mxu1 %v4054_v5  ;;  %4695 = vmatpush3.msra.mxu0 %v4086_v8 }
 0xa53   : > { %4658 = vmatprep.subr.mxu1 %v4069_v10  ;;  %4696 = vmatprep.subr.mxu0 %v4101_v11 }
 0xa54   : > { %4659 = vmatpush3.msra.mxu1 %v4053_v12  ;;  %4697 = vmatpush3.msra.mxu0 %v4085_v13 }
 0xa55   : > { %4660 = vmatprep.subr.mxu1 %v4068_v16  ;;  %4698 = vmatprep.subr.mxu0 %v4100_v17 }
 0xa56   : > { %4661 = vmatpush3.msra.mxu1 %v4052_v19  ;;  %4699 = vmatpush3.msra.mxu0 %v4084_v20 }
 0xa57   : > { %4662 = vmatprep.subr.mxu1 %v4067_v21  ;;  %4700 = vmatprep.subr.mxu0 %v4099_v24 }
 0xa58   : > { %4663 = vmatpush3.msra.mxu1 %v4051_v30  ;;  %4701 = vmatpush3.msra.mxu0 %v4083_v31 }
 0xa59   : > { %4664 = vmatprep.subr.mxu1 %v4066_v32  ;;  %4702 = vmatprep.subr.mxu0 %v4098_v34 }
 0xa5a   : > { %4665 = vmatpush3.msra.mxu1 %v4050_v46  ;;  %4703 = vmatpush3.msra.mxu0 %v4082_v49 }
 0xa5b   : > { %4666 = vmatprep.subr.mxu1 %v4065_v35  ;;  %4704 = vmatprep.subr.mxu0 %v4097_v51 }
 0xa5c   : > { %4667 = vmatpush3.msra.mxu1 %v4049_v41  ;;  %4705 = vmatpush3.msra.mxu0 %v4081_v45 }
 0xa5d   : > { %4668 = vmatprep.subr.mxu1 %v4064_v28  ;;  %4706 = vmatprep.subr.mxu0 %v4096_v36 }
 0xa5e   : > { %4669 = vmatpush3.msra.mxu1 %v4048_v55  ;;  %4707 = vmatpush3.msra.mxu0 %v4080_v37 }
 0xafd   : > { %v3888_v57 = vpop.f32.mrf.mxu1  ;;  %v3965_v47 = vpop.f32.mrf.mxu0 }
 0xafe   : > { %v6262_v61 = vadd.f32 %v3888_v57, %v3805_v0  ;;  %v6264_v44 = vadd.f32 %v3965_v47, %v3813_v40 }
 0xaff   : > { %v3890_v43 = vpop.f32.mrf.mxu1  ;;  %v3967_v14 = vpop.f32.mrf.mxu0 }
 0xb00   : > { %v3976_v48 = vmul.f32 %v6262_v61, %v6262_v61  ;;  %v3978_v33 = vmul.f32 %v6264_v44, %v6264_v44  ;;  %v6270_v63 = vadd.f32 %v3890_v43, %v3809_v42  ;;  %v6272_v27 = vadd.f32 %v3967_v14, %v3817_v50 }
 0xb01   : > { %v3894_v29 = vpop.f32.mrf.mxu1  ;;  %v3971_v58 = vpop.f32.mrf.mxu0 }
 0xb02   : > { %v3984_v38 = vmul.f32 %v3976_v48, %v6262_v61  ;;  %v3986_v53 = vmul.f32 %v3978_v33, %v6264_v44  ;;  %v3977_v52 = vmul.f32 %v6270_v63, %v6270_v63  ;;  %v3979_v59 = vmul.f32 %v6272_v27, %v6272_v27 }
 0xb03   : > { %v6280_v56 = vadd.f32 %v3894_v29, %v3805_v0  ;;  %v6282_v4 = vadd.f32 %v3971_v58, %v3813_v40  ;;  %v3896_v7 = vpop.f32.mrf.mxu1  ;;  %v3973_v15 = vpop.f32.mrf.mxu0 }
 0xb04   : > { %v3992_v18 = vmul.f32 0.044715, %v3984_v38  ;;  %v3994_v9 = vmul.f32 0.044715, %v3986_v53  ;;  %v3985_v60 = vmul.f32 %v3977_v52, %v6270_v63  ;;  %v3987_v6 = vmul.f32 %v3979_v59, %v6272_v27 }
 0xb05   : > { %v3980_v26 = vmul.f32 %v6280_v56, %v6280_v56  ;;  %v3982_v54 = vmul.f32 %v6282_v4, %v6282_v4  ;;  %v6290_v62 = vadd.f32 %v3896_v7, %v3809_v42  ;;  %v6292_v1 = vadd.f32 %v3973_v15, %v3817_v50 }
 0xb06   : > { %v4000_v2 = vadd.f32 %v3992_v18, %v6262_v61  ;;  %v4002_v3 = vadd.f32 %v3994_v9, %v6264_v44  ;;  %v3993_v5 = vmul.f32 0.044715, %v3985_v60  ;;  %v3995_v8 = vmul.f32 0.044715, %v3987_v6 }
 0xb07   : > { %v3988_v10 = vmul.f32 %v3980_v26, %v6280_v56  ;;  %v3990_v11 = vmul.f32 %v3982_v54, %v6282_v4  ;;  %v3981_v12 = vmul.f32 %v6290_v62, %v6290_v62  ;;  %v3983_v13 = vmul.f32 %v6292_v1, %v6292_v1 }
 0xb08   : > { %v4008_v16 = vmul.f32 0.7978846, %v4000_v2  ;;  %v4010_v17 = vmul.f32 0.7978846, %v4002_v3  ;;  %v4001_v19 = vadd.f32 %v3993_v5, %v6270_v63  ;;  %v4003_v20 = vadd.f32 %v3995_v8, %v6272_v27 }
 0xb09   : > { %v3996_v21 = vmul.f32 0.044715, %v3988_v10  ;;  %v3998_v24 = vmul.f32 0.044715, %v3990_v11  ;;  %v3989_v30 = vmul.f32 %v3981_v12, %v6290_v62  ;;  %v3991_v31 = vmul.f32 %v3983_v13, %v6292_v1  ;;  %v4512_v10 = vld [vmem:[%s6386_s12] ss:$0 sm:$0xff] }
 0xb0a   : > { %5160 = vtanh.f32 %v4008_v16  ;;  %v4009_v32 = vmul.f32 0.7978846, %v4001_v19  ;;  %v4011_v34 = vmul.f32 0.7978846, %v4003_v20 }
 0xb0b   : > { %5162 = vtanh.f32 %v4010_v17  ;;  %v4004_v46 = vadd.f32 %v3996_v21, %v6280_v56  ;;  %v4006_v49 = vadd.f32 %v3998_v24, %v6282_v4  ;;  %v3997_v35 = vmul.f32 0.044715, %v3989_v30 }
 0xb0c   : > { %5164 = vtanh.f32 %v4009_v32  ;;  %v3999_v51 = vmul.f32 0.044715, %v3991_v31 }
 0xb0d   : > { %5166 = vtanh.f32 %v4011_v34  ;;  %v4012_v41 = vmul.f32 0.7978846, %v4004_v46  ;;  %v4014_v45 = vmul.f32 0.7978846, %v4006_v49  ;;  %v4005_v28 = vadd.f32 %v3997_v35, %v6290_v62 }
 0xb0e   : > { %v4007_v36 = vadd.f32 %v3999_v51, %v6292_v1 }
 0xb0f   : > { %5168 = vtanh.f32 %v4012_v41  ;;  %v4013_v55 = vmul.f32 0.7978846, %v4005_v28 }
 0xb10   : > { %5170 = vtanh.f32 %v4014_v45  ;;  %v4015_v37 = vmul.f32 0.7978846, %v4007_v36 }
 0xb11   : > { %5172 = vtanh.f32 %v4013_v55 }
 0xb12   : > { %5174 = vtanh.f32 %v4015_v37 }
 0xb17   : > { %v5161_v23 = vpop.eup %5160 }
 0xb18   : > { %v5163_v39 = vpop.eup %5162  ;;  %v4024_v0 = vadd.f32 1.0, %v5161_v23 }
 0xb19   : > { %v5165_v40 = vpop.eup %5164  ;;  %v4026_v42 = vadd.f32 1.0, %v5163_v39 }
 0xb1a   : > { %v5167_v50 = vpop.eup %5166  ;;  %v4025_v57 = vadd.f32 1.0, %v5165_v40  ;;  %v4032_v47 = vmul.f32 0.5, %v4024_v0 }
 0xb1b   : > { %v4027_v43 = vadd.f32 1.0, %v5167_v50  ;;  %v4034_v48 = vmul.f32 0.5, %v4026_v42 }
 0xb1c   : > { %v5169_v14 = vpop.eup %5168  ;;  %v4033_v33 = vmul.f32 0.5, %v4025_v57  ;;  %v4040_v15 = vmul.f32 %v4032_v47, %v6262_v61 }
 0xb1d   : > { %v5171_v29 = vpop.eup %5170  ;;  %v4035_v58 = vmul.f32 0.5, %v4027_v43  ;;  %v4028_v38 = vadd.f32 1.0, %v5169_v14  ;;  %v4042_v60 = vmul.f32 %v4034_v48, %v6264_v44 }
 0xb1e   : > { %v5173_v53 = vpop.eup %5172  ;;  %v4041_v52 = vmul.f32 %v4033_v33, %v6270_v63  ;;  %v4030_v59 = vadd.f32 1.0, %v5171_v29 }
 0xb1f   : > { %v5175_v7 = vpop.eup %5174  ;;  %v4043_v18 = vmul.f32 %v4035_v58, %v6272_v27  ;;  %v4029_v9 = vadd.f32 1.0, %v5173_v53  ;;  %v4036_v26 = vmul.f32 0.5, %v4028_v38 }
 0xb20   : > { %4183 = vmatprep.mubr.f32.mxu1 %v4041_v52  ;;  %v4031_v6 = vadd.f32 1.0, %v5175_v7  ;;  %v4038_v2 = vmul.f32 0.5, %v4030_v59 }
 0xb21   : > { %4258 = vmatprep.mubr.f32.mxu0 %v4043_v18  ;;  %4184 = vmatmul.mubr.f32.vlgmr.msra.gmra.mxu1 %v4040_v15  ;;  %v4037_v54 = vmul.f32 0.5, %v4029_v9  ;;  %v4044_v61 = vmul.f32 %v4036_v26, %v6280_v56 }
 0xb22   : > { %4259 = vmatmul.mubr.f32.vlgmr.msra.gmra.mxu0 %v4042_v60  ;;  %v4039_v3 = vmul.f32 0.5, %v4031_v6  ;;  %v4046_v27 = vmul.f32 %v4038_v2, %v6282_v4 }
 0xb23   : > { %v4045_v63 = vmul.f32 %v4037_v54, %v6290_v62 }
 0xb24   : > { %v4047_v5 = vmul.f32 %v4039_v3, %v6292_v1 }
 0xb25   : > { %4188 = vmatprep.mubr.f32.mxu1 %v4045_v63 }
 0xb26   : > { %4263 = vmatprep.mubr.f32.mxu0 %v4047_v5  ;;  %4189 = vmatmul.mubr.f32.gmra.mxu1 %v4044_v61 }
 0xb27   : > { %4264 = vmatmul.mubr.f32.gmra.mxu0 %v4046_v27 }
 0xbe1   : > { %v4670_v44 = vpop.f32.mrf.mxu1 }
 0xbe2   : > { %v4708_v8 = vpop.f32.mrf.mxu0 }
 0xbe3   : > { %v4671_v11 = vpop.f32.mrf.mxu1 }
 0xbe4   : > { %v4672_v62 = vadd.f32 %v4671_v11, %v4670_v44  ;;  %v4709_v12 = vpop.f32.mrf.mxu0 }
 0xbe5   : > { %v4710_v13 = vadd.f32 %v4709_v12, %v4708_v8 }
 0xbe6   : > { %v4186_v1 = vadd.f32 %v4672_v62, %v4512_v10  ;;  %v4673_v56 = vpop.f32.mrf.mxu1 }
 0xbe7   : > { %v4711_v16 = vpop.f32.mrf.mxu0 }
 0xbe8   : > { %v4261_v17 = vadd.f32 %v4710_v13, %v4186_v1  ;;  %v4674_v4 = vpop.f32.mrf.mxu1 }
 0xbe9   : > { %v4675_v19 = vadd.f32 %v4674_v4, %v4673_v56  ;;  %v4712_v20 = vpop.f32.mrf.mxu0 }
 0xbea   : > { %v4269_v21 = vadd.f32 %v6238_v25, %v4261_v17  ;;  %v4713_v30 = vadd.f32 %v4712_v20, %v4711_v16 }
 0xbeb   : > { %v4191_v24 = vadd.f32 %v4675_v19, %v4512_v10 }
 0xbec   : > { %4271 = vst [vmem:[%s571_s21] sm:$0xff] %v4269_v21 }
 0xbed   : > { %v4266_v31 = vadd.f32 %v4713_v30, %v4191_v24 }
 0xbef   : > { %v4270_v25 = vadd.f32 %v6232_v22, %v4266_v31 }
 0xbf1   : > { %4272 = vst [vmem:[%s571_s21 + $0x8] sm:$0xff] %v4270_v25 }
 0xbf2   : > { %5377 = shalt.err (!%p5374_p8)
}
 0xbf3   : > { %s5378_s27 = scalar_lea.hbm %s6330_s24, 256  ;;  %s5382_s9 = scalar_lea.hbm %s6435_s13, 512 }
 0xbf4   : > { %p5379_p3 = scmp.ne.s32.totalorder %s6330_s24, %s5378_s27  ;;  %p5383_p2 = scmp.lt.s32.totalorder %s6330_s24, %s6435_s13 }
 0xbf5   : > { %p5384_p10 = scmp.lt.s32.totalorder %s5382_s9, %s5378_s27 }
 0xbf6   : > { %p5380_p7 = pnand %p5379_p3, %p6436_p5 }
 0xbf7   : > { %p5385_p13 = por %p5384_p10, %p5383_p2 }
 0xbf8   : > { %p5381_p12 = pneg %p5380_p7 }
 0xbfa   : > { %p5386_p0 = pnand %p5385_p13, %p5381_p12 }
 0xbfc   : > { %5389 = shalt.err (!%p5386_p0)
}
 0xbfd   : > { %s5467_s4 = smov 128   ;;  %s5468_s21 = smov 8  }
 0xbfe   : > { %5000 = dma.vmem_to_hbm [thread:$0]  (%p6436_p5), %s6325_s2, 256, %s6330_s24, %s4274_s15, %s5467_s4, %s5467_s4, %s5468_s21  }
 0xbff PF: > { %s6437_s20 = sld [smem:[#allocation24_spill]]  ;;  %s4302_s11 = sand.u32 1, %s5432_s25  }
 0xc00   : > { %p6439_p11 = scmp.ge.s32.totalorder %s5444_s28, 2  ;;  %s4303_s17 = scalar_lea.sflag [#allocation4], %s4302_s11 }
 0xc05   : > { %p6438_p9 = scmp.ne.s32.totalorder %s6437_s20, 0 }
 0xc07   : > { %p5026_p1 = pnand %p6439_p11, %p6438_p9 }
 0xc09   : > { %p5027_p4 = pneg %p5026_p1 }
 0xc0b   : > { %5427 = dma.done.wait (%p5027_p4), %s4303_s17, 256  }
 0xc0c   : > { %5429 = vsyncadd (%p5027_p4), %s4303_s17, 4294967040  ;;  %s6440_s28 = sld [smem:[#allocation22_spill]]  ;;  %s6443_s25 = smov %s5436_s26 }
 0xc0d   : > { %s6441_s22 = sld [smem:[#allocation21_spill]] }
 0xc0e   : > { %s6442_s27 = sld [smem:[#allocation23_spill]] }
 0xc12   : > { %p31_p6 = scmp.ge.s32.totalorder %s6440_s28, 4  }
 0xc13   : > { %s6444_s26 = smov %s6441_s22 }
 0xc14   :  { %33 = sbr.rel (!%p31_p6) target bundleno = 17 (0x11), region = 150 }
 0xc19   :  { %4308 = vsyncpa [#allocation3], 1 }
 0xc1a   :  { %4310 = vsyncpa [#allocation3 + $0x1], 1 }
 0xc1b   :  { %4311 = vsyncpa [#allocation6], 1 }
 0xc1c   :  { %4313 = vsyncpa [#allocation6 + $0x1], 1 }
 0xc1d   :  { %4314 = vsyncpa [#allocation9], 1 }
 0xc1e   :  { %4315 = vsyncpa [#allocation12], 1 }
 0xc1f   :  { %4316 = vsyncpa [#allocation4], 1 }
 0xc20   :  { %4318 = vsyncpa [#allocation4 + $0x1], 1 }

</bundles_post_ra>
